<compile_context>
chip_gen: v7x
topology: tpu7x:2x2x1
jax: 0.10.0
libtpu: 0.0.40
codegen_flags: <defaults>
</compile_context>

<pallas_src>
import jax
import jax.numpy as jnp
from jax.experimental import pallas as pl


# ----------------------------------------------------------------------------
# Config (small, deterministic)
# ----------------------------------------------------------------------------
VOCAB = 100
MAX_POS = 16
TYPE_VOCAB = 2
HIDDEN = 32
NUM_HEADS = 4
HEAD_DIM = HIDDEN // NUM_HEADS
INTERMEDIATE = 64
NUM_LAYERS = 2
NUM_LABELS = 8
LN_EPS = 1e-12

BATCH = 2
SEQ = 8

# small-param slab row width (widest packed vector is the fused QKV bias, 3H)
_PW = 3 * HIDDEN


# ----------------------------------------------------------------------------
# Fused Pallas kernel: embeddings-LN -> N transformer layers -> pooler -> cls
# ----------------------------------------------------------------------------
def _nlp_fused_kernel(x_ref, maskb_ref, wslab_ref, pslab_ref, out_ref):
    # x_ref:     (B*S, H)       f32  embedded tokens (pre-LN)
    # maskb_ref: (B, 1, S)      f32  additive attention bias: (1-mask)*-10000
    # wslab_ref: (L+1, H, 256)  bf16 [wqkv | wo | w1 | w2^T] per layer,
    #                                last slot = [pool_w | cls_w | 0...]
    # pslab_ref: (2+8L+2, 96)   f32  biases / LN params, one row each
    # out_ref:   (B, NUM_LABELS)
    B, S = maskb_ref.shape[0], maskb_ref.shape[2]
    H = x_ref.shape[1]
    I = INTERMEDIATE
    nH, Dh = NUM_HEADS, HEAD_DIM
    L = wslab_ref.shape[0] - 1

    P = pslab_ref[...]                                   # one DMA'd small slab

    def pvec(r, w):                                      # (1, w) param row
        return P[r:r + 1, 0:w]

    def layer_norm(z, g, b):
        mu = jnp.mean(z, axis=-1, keepdims=True)
        var = jnp.mean((z - mu) ** 2, axis=-1, keepdims=True)
        return (z - mu) * jax.lax.rsqrt(var + LN_EPS) * g + b

    def gelu(z):                                         # tanh-approx GELU (f32)
        c = jnp.float32(0.7978845608028654)              # sqrt(2/pi)
        return 0.5 * z * (1.0 + jnp.tanh(c * (z + 0.044715 * z * z * z)))

    def mm(a, w_bf16):                                   # bf16 MXU feed, f32 acc
        return jnp.dot(a.astype(jnp.bfloat16), w_bf16,
                       preferred_element_type=jnp.float32)

    # --- embeddings LayerNorm ---
    x = layer_norm(x_ref[...], pvec(0, H), pvec(1, H))   # (B*S, H) f32
    mask_bias = maskb_ref[...]                           # (B, 1, S)

    # --- transformer layers (unrolled at trace time) ---
    for l in range(L):
        Wl = wslab_ref[l]                                # (H, 256) bf16
        r0 = 2 + 8 * l

        # fused QKV projection (1/sqrt(Dh) pre-folded into the Q columns)
        qkv = mm(x, Wl[:, 0:3 * H]) + pvec(r0 + 0, 3 * H)          # (B*S, 3H)
        qkv3 = qkv.astype(jnp.bfloat16).reshape(B, S, 3 * H)       # (B, S, 3H)

        heads = []
        for h in range(nH):                              # each head batched over B
            qh = qkv3[:, :, 0 * H + h * Dh: 0 * H + (h + 1) * Dh]  # (B, S, Dh)
            kh = qkv3[:, :, 1 * H + h * Dh: 1 * H + (h + 1) * Dh]
            vh = qkv3[:, :, 2 * H + h * Dh: 2 * H + (h + 1) * Dh]
            s = jnp.einsum('bqd,bkd->bqk', qh, kh,
                           preferred_element_type=jnp.float32)     # (B, S, S)
            s = s + mask_bias                                      # key-side mask
            # no row-max subtraction: logits are tiny and exp(-10000) == 0 exactly
            p = jnp.exp(s)
            p = p * pl.reciprocal(jnp.sum(p, axis=-1, keepdims=True), approx=True)
            heads.append(jnp.einsum('bqk,bkd->bqd', p.astype(jnp.bfloat16), vh,
                                    preferred_element_type=jnp.float32))
        ctx = jnp.concatenate(heads, axis=-1).reshape(B * S, H)    # (B*S, H)

        # output projection + residual + LayerNorm (fused epilogue)
        attn = mm(ctx, Wl[:, 3 * H:4 * H]) + pvec(r0 + 1, H)
        x = layer_norm(x + attn, pvec(r0 + 2, H), pvec(r0 + 3, H))

        # FFN: GELU(x@W1+b1) @ W2 + b2, residual + LayerNorm
        h1 = gelu(mm(x, Wl[:, 4 * H:4 * H + I]) + pvec(r0 + 4, I))
        # w2 is stored transposed -> contract on dim 1 of both (MXU trans-B path)
        h2 = jax.lax.dot_general(
            h1.astype(jnp.bfloat16), Wl[:, 4 * H + I:4 * H + 2 * I],
            dimension_numbers=(((1,), (1,)), ((), ())),
            preferred_element_type=jnp.float32) + pvec(r0 + 5, H)
        x = layer_norm(x + h2, pvec(r0 + 6, H), pvec(r0 + 7, H))

    # --- pooler: tanh(W * hidden[CLS] + b), CLS rows via one reshape+index ---
    Wh = wslab_ref[L]                                    # (H, 256) bf16
    cls_rows = x.reshape(B, S, H)[:, 0, :]               # (B, H)
    pooled = jnp.tanh(mm(cls_rows, Wh[:, 0:H]) + pvec(2 + 8 * L, H))

    # dropout(0.1): eval/inference semantics -> identity
    # TODO(synk): training-mode stochastic dropout (pltpu.prng_*) not wired in.

    # --- classifier (only these (B, 8) logits ever leave VMEM) ---
    logits = mm(pooled, Wh[:, H:H + NUM_LABELS]) + pvec(2 + 8 * L + 1, NUM_LABELS)
    out_ref[...] = logits.astype(out_ref.dtype)


def _full_spec(a):
    """Whole-array single-block spec (no grid -> index_map takes no args)."""
    zeros = (0,) * a.ndim
    return pl.BlockSpec(a.shape, lambda *_: zeros)


def nlp_encoder_fused(x, mask_bias, wslab, pslab):
    operands = (x, mask_bias, wslab, pslab)
    B = mask_bias.shape[0]
    return pl.pallas_call(
        _nlp_fused_kernel,
        out_shape=jax.ShapeDtypeStruct((B, NUM_LABELS), jnp.float32),
        in_specs=[_full_spec(a) for a in operands],
        out_specs=pl.BlockSpec((B, NUM_LABELS), lambda *_: (0, 0)),
    )(*operands)


# ----------------------------------------------------------------------------
# Parameter init + PACKING (done once at init, off the inference path)
# ----------------------------------------------------------------------------
def init_params(key):
    std = 0.02
    ks = iter(jax.random.split(key, 64))

    def nrm(shape):
        return (std * jax.random.normal(next(ks), shape)).astype(jnp.float32)

    H, I, L = HIDDEN, INTERMEDIATE, NUM_LAYERS
    q_scale = jnp.float32(1.0 / (HEAD_DIM ** 0.5))

    def row(v):
        v = jnp.asarray(v, jnp.float32).reshape(1, -1)
        return jnp.pad(v, ((0, 0), (0, _PW - v.shape[1])))

    w_slabs = []
    p_rows = [row(jnp.ones((H,))), row(jnp.zeros((H,)))]          # emb LN g / b
    for _ in range(L):
        wq, wk, wv = nrm((H, H)), nrm((H, H)), nrm((H, H))
        wo, w1, w2 = nrm((H, H)), nrm((H, I)), nrm((I, H))
        # fold 1/sqrt(Dh) into Q weight (Q bias is zero, scaling is a no-op there)
        wqkv = jnp.concatenate([wq * q_scale, wk, wv], axis=1)    # (H, 3H)
        w_slabs.append(jnp.concatenate([wqkv, wo, w1, w2.T], axis=1))  # (H, 256)
        p_rows += [
            row(jnp.zeros((3 * H,))),                             # bqkv
            row(jnp.zeros((H,))),                                 # bo
            row(jnp.ones((H,))), row(jnp.zeros((H,))),            # ln1 g / b
            row(jnp.zeros((I,))),                                 # b1
            row(jnp.zeros((H,))),                                 # b2
            row(jnp.ones((H,))), row(jnp.zeros((H,))),            # ln2 g / b
        ]
    pooler_w, cls_w = nrm((H, H)), nrm((H, NUM_LABELS))
    head = jnp.zeros((H, 4 * H + 2 * I), jnp.float32)
    head = head.at[:, 0:H].set(pooler_w).at[:, H:H + NUM_LABELS].set(cls_w)
    w_slabs.append(head)
    p_rows += [row(jnp.zeros((H,))), row(jnp.zeros((NUM_LABELS,)))]  # pool_b, cls_b

    return {
        "word_emb": nrm((VOCAB, H)),
        "pos_emb": nrm((MAX_POS, H)),
        "type_emb": nrm((TYPE_VOCAB, H)),
        "wslab": jnp.stack(w_slabs).astype(jnp.bfloat16),         # (L+1, H, 256)
        "pslab": jnp.concatenate(p_rows, axis=0),                 # (2+8L+2, 96) f32
    }


# ----------------------------------------------------------------------------
# Forward pass: embedding gathers (glue) + one fused Pallas kernel
# ----------------------------------------------------------------------------
@jax.jit
def nlp_model_forward(params, input_ids, attention_mask):
    B, S = input_ids.shape

    # --- embeddings (data-dependent gather stays in plain JAX) ---
    positions = jnp.arange(S, dtype=jnp.int32)
    emb = (
        jnp.take(params["word_emb"], input_ids, axis=0)           # (B, S, H)
        + jnp.take(params["pos_emb"], positions, axis=0)[None]    # (1, S, H)
        + params["type_emb"][0][None, None, :]                    # token_type_ids=0
    )
    x = emb.reshape(B * S, HIDDEN).astype(jnp.float32)

    # additive attention bias, computed once: (1 - mask) * -10000
    mask_bias = ((1.0 - attention_mask.astype(jnp.float32))
                 * jnp.float32(-10000.0)).reshape(B, 1, S)

    return nlp_encoder_fused(x, mask_bias, params["wslab"], params["pslab"])


# ----------------------------------------------------------------------------
# Main
# ----------------------------------------------------------------------------
if __name__ == "__main__":
    key = jax.random.PRNGKey(0)
    k_param, k_ids = jax.random.split(key)

    params = init_params(k_param)

    input_ids = jax.random.randint(k_ids, (BATCH, SEQ), 0, VOCAB, dtype=jnp.int32)
    attention_mask = jnp.ones((BATCH, SEQ), dtype=jnp.int32)
    # make the second sequence shorter (last 3 tokens padded/masked)
    attention_mask = attention_mask.at[1, SEQ - 3:].set(0)

    logits = nlp_model_forward(params, input_ids, attention_mask)
    logits = jax.block_until_ready(logits)

    assert logits.shape == (BATCH, NUM_LABELS)
    assert logits.dtype == jnp.float32
    assert bool(jnp.all(jnp.isfinite(logits)))
    print("KERNEL_OK")
</pallas_src>

<mosaic_0001>
module attributes {stable_mosaic.version = 11 : i64} {
  func.func @_nlp_fused_kernel(%arg0: memref<16x32xf32, #tpu.memory_space<vmem>>, %arg1: memref<2x1x8xf32, #tpu.memory_space<vmem>>, %arg2: memref<3x32x256xbf16, #tpu.memory_space<vmem>>, %arg3: memref<20x96xf32, #tpu.memory_space<vmem>>, %arg4: memref<2x8xf32, #tpu.memory_space<vmem>>) attributes {dimension_semantics = [], scalar_prefetch = 0 : i64, scratch_operands = 0 : i64, tpu.core_type = #tpu.core_type<tc>} {
    %c0 = arith.constant 0 : index
    %c0_0 = arith.constant 0 : index
    %0 = vector.load %arg3[%c0, %c0_0] : memref<20x96xf32, #tpu.memory_space<vmem>>, vector<20x96xf32>
    %c0_1 = arith.constant 0 : index
    %c0_2 = arith.constant 0 : index
    %1 = vector.load %arg0[%c0_1, %c0_2] : memref<16x32xf32, #tpu.memory_space<vmem>>, vector<16x32xf32>
    %2 = vector.extract_strided_slice %0 {offsets = [0, 0], sizes = [1, 32], strides = [1, 1]} : vector<20x96xf32> to vector<1x32xf32>
    %3 = vector.extract_strided_slice %0 {offsets = [1, 0], sizes = [1, 32], strides = [1, 1]} : vector<20x96xf32> to vector<1x32xf32>
    %cst = arith.constant dense<0.000000e+00> : vector<16xf32>
    %4 = vector.multi_reduction <add>, %1, %cst [1] : vector<16x32xf32> to vector<16xf32>
    %5 = vector.shape_cast %4 : vector<16xf32> to vector<16x1xf32>
    %cst_3 = arith.constant 3.200000e+01 : f32
    %6 = vector.broadcast %cst_3 : f32 to vector<16x1xf32>
    %7 = arith.divf %5, %6 : vector<16x1xf32>
    %8 = vector.broadcast %7 : vector<16x1xf32> to vector<16x32xf32>
    %9 = arith.subf %1, %8 : vector<16x32xf32>
    %10 = arith.mulf %9, %9 : vector<16x32xf32>
    %cst_4 = arith.constant dense<0.000000e+00> : vector<16xf32>
    %11 = vector.multi_reduction <add>, %10, %cst_4 [1] : vector<16x32xf32> to vector<16xf32>
    %12 = vector.shape_cast %11 : vector<16xf32> to vector<16x1xf32>
    %cst_5 = arith.constant 3.200000e+01 : f32
    %13 = vector.broadcast %cst_5 : f32 to vector<16x1xf32>
    %14 = arith.divf %12, %13 : vector<16x1xf32>
    %15 = vector.broadcast %7 : vector<16x1xf32> to vector<16x32xf32>
    %16 = arith.subf %1, %15 : vector<16x32xf32>
    %cst_6 = arith.constant 9.99999996E-13 : f32
    %17 = vector.broadcast %cst_6 : f32 to vector<16x1xf32>
    %18 = arith.addf %14, %17 : vector<16x1xf32>
    %19 = math.rsqrt %18 : vector<16x1xf32>
    %20 = vector.broadcast %19 : vector<16x1xf32> to vector<16x32xf32>
    %21 = arith.mulf %16, %20 : vector<16x32xf32>
    %22 = vector.broadcast %2 : vector<1x32xf32> to vector<16x32xf32>
    %23 = arith.mulf %21, %22 : vector<16x32xf32>
    %24 = vector.broadcast %3 : vector<1x32xf32> to vector<16x32xf32>
    %25 = arith.addf %23, %24 : vector<16x32xf32>
    %c0_7 = arith.constant 0 : index
    %c0_8 = arith.constant 0 : index
    %c0_9 = arith.constant 0 : index
    %26 = vector.load %arg1[%c0_7, %c0_8, %c0_9] : memref<2x1x8xf32, #tpu.memory_space<vmem>>, vector<2x1x8xf32>
    %c0_10 = arith.constant 0 : index
    %c0_11 = arith.constant 0 : index
    %c0_12 = arith.constant 0 : index
    %27 = vector.load %arg2[%c0_10, %c0_11, %c0_12] : memref<3x32x256xbf16, #tpu.memory_space<vmem>>, vector<1x32x256xbf16>
    %28 = vector.shape_cast %27 : vector<1x32x256xbf16> to vector<32x256xbf16>
    %29 = vector.extract_strided_slice %28 {offsets = [0, 0], sizes = [32, 96], strides = [1, 1]} : vector<32x256xbf16> to vector<32x96xbf16>
    %30 = arith.truncf %25 : vector<16x32xf32> to vector<16x32xbf16>
    %cst_13 = arith.constant dense<0.000000e+00> : vector<16x96xf32>
    %31 = tpu.matmul %30, %29, %cst_13 {dimension_numbers = #tpu.dot_dimension_numbers<[1], [0], [0], [1], [0, 0, 1, 1], [], []>} : vector<16x32xbf16>, vector<32x96xbf16>, vector<16x96xf32> -> vector<16x96xf32>
    %32 = vector.extract_strided_slice %0 {offsets = [2, 0], sizes = [1, 96], strides = [1, 1]} : vector<20x96xf32> to vector<1x96xf32>
    %33 = vector.broadcast %32 : vector<1x96xf32> to vector<16x96xf32>
    %34 = arith.addf %31, %33 : vector<16x96xf32>
    %35 = arith.truncf %34 : vector<16x96xf32> to vector<16x96xbf16>
    %36 = vector.shape_cast %35 : vector<16x96xbf16> to vector<2x8x96xbf16>
    %37 = vector.extract_strided_slice %36 {offsets = [0, 0, 0], sizes = [2, 8, 8], strides = [1, 1, 1]} : vector<2x8x96xbf16> to vector<2x8x8xbf16>
    %38 = vector.extract_strided_slice %36 {offsets = [0, 0, 32], sizes = [2, 8, 8], strides = [1, 1, 1]} : vector<2x8x96xbf16> to vector<2x8x8xbf16>
    %39 = vector.extract_strided_slice %36 {offsets = [0, 0, 64], sizes = [2, 8, 8], strides = [1, 1, 1]} : vector<2x8x96xbf16> to vector<2x8x8xbf16>
    "tpu.trace_start"() <{level = 10 : i32, message = "bqd,bkd->bqk"}> : () -> ()
    %cst_14 = arith.constant dense<0.000000e+00> : vector<2x8x8xf32>
    %40 = tpu.matmul %37, %38, %cst_14 {dimension_numbers = #tpu.dot_dimension_numbers<[2], [2], [1], [1], [0, 0, 0, 1, 1, 1], [0], [0]>} : vector<2x8x8xbf16>, vector<2x8x8xbf16>, vector<2x8x8xf32> -> vector<2x8x8xf32>
    "tpu.trace_stop"() : () -> ()
    %41 = vector.broadcast %26 : vector<2x1x8xf32> to vector<2x8x8xf32>
    %42 = arith.addf %40, %41 : vector<2x8x8xf32>
    %43 = math.exp %42 : vector<2x8x8xf32>
    %cst_15 = arith.constant dense<0.000000e+00> : vector<2x8xf32>
    %44 = vector.multi_reduction <add>, %43, %cst_15 [2] : vector<2x8x8xf32> to vector<2x8xf32>
    %45 = vector.shape_cast %44 : vector<2x8xf32> to vector<2x8x1xf32>
    %46 = tpu.reciprocal %45 {approx = true} : vector<2x8x1xf32> -> vector<2x8x1xf32>
    %47 = vector.broadcast %46 : vector<2x8x1xf32> to vector<2x8x8xf32>
    %48 = arith.mulf %43, %47 : vector<2x8x8xf32>
    %49 = arith.truncf %48 : vector<2x8x8xf32> to vector<2x8x8xbf16>
    "tpu.trace_start"() <{level = 10 : i32, message = "bqk,bkd->bqd"}> : () -> ()
    %cst_16 = arith.constant dense<0.000000e+00> : vector<2x8x8xf32>
    %50 = tpu.matmul %49, %39, %cst_16 {dimension_numbers = #tpu.dot_dimension_numbers<[2], [1], [1], [2], [0, 0, 0, 1, 1, 2], [0], [0]>} : vector<2x8x8xbf16>, vector<2x8x8xbf16>, vector<2x8x8xf32> -> vector<2x8x8xf32>
    "tpu.trace_stop"() : () -> ()
    %51 = vector.extract_strided_slice %36 {offsets = [0, 0, 8], sizes = [2, 8, 8], strides = [1, 1, 1]} : vector<2x8x96xbf16> to vector<2x8x8xbf16>
    %52 = vector.extract_strided_slice %36 {offsets = [0, 0, 40], sizes = [2, 8, 8], strides = [1, 1, 1]} : vector<2x8x96xbf16> to vector<2x8x8xbf16>
    %53 = vector.extract_strided_slice %36 {offsets = [0, 0, 72], sizes = [2, 8, 8], strides = [1, 1, 1]} : vector<2x8x96xbf16> to vector<2x8x8xbf16>
    "tpu.trace_start"() <{level = 10 : i32, message = "bqd,bkd->bqk"}> : () -> ()
    %cst_17 = arith.constant dense<0.000000e+00> : vector<2x8x8xf32>
    %54 = tpu.matmul %51, %52, %cst_17 {dimension_numbers = #tpu.dot_dimension_numbers<[2], [2], [1], [1], [0, 0, 0, 1, 1, 1], [0], [0]>} : vector<2x8x8xbf16>, vector<2x8x8xbf16>, vector<2x8x8xf32> -> vector<2x8x8xf32>
    "tpu.trace_stop"() : () -> ()
    %55 = vector.broadcast %26 : vector<2x1x8xf32> to vector<2x8x8xf32>
    %56 = arith.addf %54, %55 : vector<2x8x8xf32>
    %57 = math.exp %56 : vector<2x8x8xf32>
    %cst_18 = arith.constant dense<0.000000e+00> : vector<2x8xf32>
    %58 = vector.multi_reduction <add>, %57, %cst_18 [2] : vector<2x8x8xf32> to vector<2x8xf32>
    %59 = vector.shape_cast %58 : vector<2x8xf32> to vector<2x8x1xf32>
    %60 = tpu.reciprocal %59 {approx = true} : vector<2x8x1xf32> -> vector<2x8x1xf32>
    %61 = vector.broadcast %60 : vector<2x8x1xf32> to vector<2x8x8xf32>
    %62 = arith.mulf %57, %61 : vector<2x8x8xf32>
    %63 = arith.truncf %62 : vector<2x8x8xf32> to vector<2x8x8xbf16>
    "tpu.trace_start"() <{level = 10 : i32, message = "bqk,bkd->bqd"}> : () -> ()
    %cst_19 = arith.constant dense<0.000000e+00> : vector<2x8x8xf32>
    %64 = tpu.matmul %63, %53, %cst_19 {dimension_numbers = #tpu.dot_dimension_numbers<[2], [1], [1], [2], [0, 0, 0, 1, 1, 2], [0], [0]>} : vector<2x8x8xbf16>, vector<2x8x8xbf16>, vector<2x8x8xf32> -> vector<2x8x8xf32>
    "tpu.trace_stop"() : () -> ()
    %65 = vector.extract_strided_slice %36 {offsets = [0, 0, 16], sizes = [2, 8, 8], strides = [1, 1, 1]} : vector<2x8x96xbf16> to vector<2x8x8xbf16>
    %66 = vector.extract_strided_slice %36 {offsets = [0, 0, 48], sizes = [2, 8, 8], strides = [1, 1, 1]} : vector<2x8x96xbf16> to vector<2x8x8xbf16>
    %67 = vector.extract_strided_slice %36 {offsets = [0, 0, 80], sizes = [2, 8, 8], strides = [1, 1, 1]} : vector<2x8x96xbf16> to vector<2x8x8xbf16>
    "tpu.trace_start"() <{level = 10 : i32, message = "bqd,bkd->bqk"}> : () -> ()
    %cst_20 = arith.constant dense<0.000000e+00> : vector<2x8x8xf32>
    %68 = tpu.matmul %65, %66, %cst_20 {dimension_numbers = #tpu.dot_dimension_numbers<[2], [2], [1], [1], [0, 0, 0, 1, 1, 1], [0], [0]>} : vector<2x8x8xbf16>, vector<2x8x8xbf16>, vector<2x8x8xf32> -> vector<2x8x8xf32>
    "tpu.trace_stop"() : () -> ()
    %69 = vector.broadcast %26 : vector<2x1x8xf32> to vector<2x8x8xf32>
    %70 = arith.addf %68, %69 : vector<2x8x8xf32>
    %71 = math.exp %70 : vector<2x8x8xf32>
    %cst_21 = arith.constant dense<0.000000e+00> : vector<2x8xf32>
    %72 = vector.multi_reduction <add>, %71, %cst_21 [2] : vector<2x8x8xf32> to vector<2x8xf32>
    %73 = vector.shape_cast %72 : vector<2x8xf32> to vector<2x8x1xf32>
    %74 = tpu.reciprocal %73 {approx = true} : vector<2x8x1xf32> -> vector<2x8x1xf32>
    %75 = vector.broadcast %74 : vector<2x8x1xf32> to vector<2x8x8xf32>
    %76 = arith.mulf %71, %75 : vector<2x8x8xf32>
    %77 = arith.truncf %76 : vector<2x8x8xf32> to vector<2x8x8xbf16>
    "tpu.trace_start"() <{level = 10 : i32, message = "bqk,bkd->bqd"}> : () -> ()
    %cst_22 = arith.constant dense<0.000000e+00> : vector<2x8x8xf32>
    %78 = tpu.matmul %77, %67, %cst_22 {dimension_numbers = #tpu.dot_dimension_numbers<[2], [1], [1], [2], [0, 0, 0, 1, 1, 2], [0], [0]>} : vector<2x8x8xbf16>, vector<2x8x8xbf16>, vector<2x8x8xf32> -> vector<2x8x8xf32>
    "tpu.trace_stop"() : () -> ()
    %79 = vector.extract_strided_slice %36 {offsets = [0, 0, 24], sizes = [2, 8, 8], strides = [1, 1, 1]} : vector<2x8x96xbf16> to vector<2x8x8xbf16>
    %80 = vector.extract_strided_slice %36 {offsets = [0, 0, 56], sizes = [2, 8, 8], strides = [1, 1, 1]} : vector<2x8x96xbf16> to vector<2x8x8xbf16>
    %81 = vector.extract_strided_slice %36 {offsets = [0, 0, 88], sizes = [2, 8, 8], strides = [1, 1, 1]} : vector<2x8x96xbf16> to vector<2x8x8xbf16>
    "tpu.trace_start"() <{level = 10 : i32, message = "bqd,bkd->bqk"}> : () -> ()
    %cst_23 = arith.constant dense<0.000000e+00> : vector<2x8x8xf32>
    %82 = tpu.matmul %79, %80, %cst_23 {dimension_numbers = #tpu.dot_dimension_numbers<[2], [2], [1], [1], [0, 0, 0, 1, 1, 1], [0], [0]>} : vector<2x8x8xbf16>, vector<2x8x8xbf16>, vector<2x8x8xf32> -> vector<2x8x8xf32>
    "tpu.trace_stop"() : () -> ()
    %83 = vector.broadcast %26 : vector<2x1x8xf32> to vector<2x8x8xf32>
    %84 = arith.addf %82, %83 : vector<2x8x8xf32>
    %85 = math.exp %84 : vector<2x8x8xf32>
    %cst_24 = arith.constant dense<0.000000e+00> : vector<2x8xf32>
    %86 = vector.multi_reduction <add>, %85, %cst_24 [2] : vector<2x8x8xf32> to vector<2x8xf32>
    %87 = vector.shape_cast %86 : vector<2x8xf32> to vector<2x8x1xf32>
    %88 = tpu.reciprocal %87 {approx = true} : vector<2x8x1xf32> -> vector<2x8x1xf32>
    %89 = vector.broadcast %88 : vector<2x8x1xf32> to vector<2x8x8xf32>
    %90 = arith.mulf %85, %89 : vector<2x8x8xf32>
    %91 = arith.truncf %90 : vector<2x8x8xf32> to vector<2x8x8xbf16>
    "tpu.trace_start"() <{level = 10 : i32, message = "bqk,bkd->bqd"}> : () -> ()
    %cst_25 = arith.constant dense<0.000000e+00> : vector<2x8x8xf32>
    %92 = tpu.matmul %91, %81, %cst_25 {dimension_numbers = #tpu.dot_dimension_numbers<[2], [1], [1], [2], [0, 0, 0, 1, 1, 2], [0], [0]>} : vector<2x8x8xbf16>, vector<2x8x8xbf16>, vector<2x8x8xf32> -> vector<2x8x8xf32>
    "tpu.trace_stop"() : () -> ()
    %93 = tpu.concatenate %50, %64, %78, %92 in 2 : vector<2x8x8xf32>, vector<2x8x8xf32>, vector<2x8x8xf32>, vector<2x8x8xf32> -> vector<2x8x32xf32>
    %94 = vector.shape_cast %93 : vector<2x8x32xf32> to vector<16x32xf32>
    %95 = vector.extract_strided_slice %28 {offsets = [0, 96], sizes = [32, 32], strides = [1, 1]} : vector<32x256xbf16> to vector<32x32xbf16>
    %96 = arith.truncf %94 : vector<16x32xf32> to vector<16x32xbf16>
    %cst_26 = arith.constant dense<0.000000e+00> : vector<16x32xf32>
    %97 = tpu.matmul %96, %95, %cst_26 {dimension_numbers = #tpu.dot_dimension_numbers<[1], [0], [0], [1], [0, 0, 1, 1], [], []>} : vector<16x32xbf16>, vector<32x32xbf16>, vector<16x32xf32> -> vector<16x32xf32>
    %98 = vector.extract_strided_slice %0 {offsets = [3, 0], sizes = [1, 32], strides = [1, 1]} : vector<20x96xf32> to vector<1x32xf32>
    %99 = vector.broadcast %98 : vector<1x32xf32> to vector<16x32xf32>
    %100 = arith.addf %97, %99 : vector<16x32xf32>
    %101 = arith.addf %25, %100 : vector<16x32xf32>
    %102 = vector.extract_strided_slice %0 {offsets = [4, 0], sizes = [1, 32], strides = [1, 1]} : vector<20x96xf32> to vector<1x32xf32>
    %103 = vector.extract_strided_slice %0 {offsets = [5, 0], sizes = [1, 32], strides = [1, 1]} : vector<20x96xf32> to vector<1x32xf32>
    %cst_27 = arith.constant dense<0.000000e+00> : vector<16xf32>
    %104 = vector.multi_reduction <add>, %101, %cst_27 [1] : vector<16x32xf32> to vector<16xf32>
    %105 = vector.shape_cast %104 : vector<16xf32> to vector<16x1xf32>
    %cst_28 = arith.constant 3.200000e+01 : f32
    %106 = vector.broadcast %cst_28 : f32 to vector<16x1xf32>
    %107 = arith.divf %105, %106 : vector<16x1xf32>
    %108 = vector.broadcast %107 : vector<16x1xf32> to vector<16x32xf32>
    %109 = arith.subf %101, %108 : vector<16x32xf32>
    %110 = arith.mulf %109, %109 : vector<16x32xf32>
    %cst_29 = arith.constant dense<0.000000e+00> : vector<16xf32>
    %111 = vector.multi_reduction <add>, %110, %cst_29 [1] : vector<16x32xf32> to vector<16xf32>
    %112 = vector.shape_cast %111 : vector<16xf32> to vector<16x1xf32>
    %cst_30 = arith.constant 3.200000e+01 : f32
    %113 = vector.broadcast %cst_30 : f32 to vector<16x1xf32>
    %114 = arith.divf %112, %113 : vector<16x1xf32>
    %115 = vector.broadcast %107 : vector<16x1xf32> to vector<16x32xf32>
    %116 = arith.subf %101, %115 : vector<16x32xf32>
    %cst_31 = arith.constant 9.99999996E-13 : f32
    %117 = vector.broadcast %cst_31 : f32 to vector<16x1xf32>
    %118 = arith.addf %114, %117 : vector<16x1xf32>
    %119 = math.rsqrt %118 : vector<16x1xf32>
    %120 = vector.broadcast %119 : vector<16x1xf32> to vector<16x32xf32>
    %121 = arith.mulf %116, %120 : vector<16x32xf32>
    %122 = vector.broadcast %102 : vector<1x32xf32> to vector<16x32xf32>
    %123 = arith.mulf %121, %122 : vector<16x32xf32>
    %124 = vector.broadcast %103 : vector<1x32xf32> to vector<16x32xf32>
    %125 = arith.addf %123, %124 : vector<16x32xf32>
    %126 = vector.extract_strided_slice %28 {offsets = [0, 128], sizes = [32, 64], strides = [1, 1]} : vector<32x256xbf16> to vector<32x64xbf16>
    %127 = arith.truncf %125 : vector<16x32xf32> to vector<16x32xbf16>
    %cst_32 = arith.constant dense<0.000000e+00> : vector<16x64xf32>
    %128 = tpu.matmul %127, %126, %cst_32 {dimension_numbers = #tpu.dot_dimension_numbers<[1], [0], [0], [1], [0, 0, 1, 1], [], []>} : vector<16x32xbf16>, vector<32x64xbf16>, vector<16x64xf32> -> vector<16x64xf32>
    %129 = vector.extract_strided_slice %0 {offsets = [6, 0], sizes = [1, 64], strides = [1, 1]} : vector<20x96xf32> to vector<1x64xf32>
    %130 = vector.broadcast %129 : vector<1x64xf32> to vector<16x64xf32>
    %131 = arith.addf %128, %130 : vector<16x64xf32>
    %cst_33 = arith.constant 5.000000e-01 : f32
    %132 = vector.broadcast %cst_33 : f32 to vector<16x64xf32>
    %133 = arith.mulf %132, %131 : vector<16x64xf32>
    %cst_34 = arith.constant 4.471500e-02 : f32
    %134 = vector.broadcast %cst_34 : f32 to vector<16x64xf32>
    %135 = arith.mulf %134, %131 : vector<16x64xf32>
    %136 = arith.mulf %135, %131 : vector<16x64xf32>
    %137 = arith.mulf %136, %131 : vector<16x64xf32>
    %138 = arith.addf %131, %137 : vector<16x64xf32>
    %cst_35 = arith.constant 0.797884583 : f32
    %139 = vector.broadcast %cst_35 : f32 to vector<16x64xf32>
    %140 = arith.mulf %139, %138 : vector<16x64xf32>
    %141 = math.tanh %140 : vector<16x64xf32>
    %cst_36 = arith.constant 1.000000e+00 : f32
    %142 = vector.broadcast %cst_36 : f32 to vector<16x64xf32>
    %143 = arith.addf %142, %141 : vector<16x64xf32>
    %144 = arith.mulf %133, %143 : vector<16x64xf32>
    %145 = arith.truncf %144 : vector<16x64xf32> to vector<16x64xbf16>
    %146 = vector.extract_strided_slice %28 {offsets = [0, 192], sizes = [32, 64], strides = [1, 1]} : vector<32x256xbf16> to vector<32x64xbf16>
    %cst_37 = arith.constant dense<0.000000e+00> : vector<16x32xf32>
    %147 = tpu.matmul %145, %146, %cst_37 {dimension_numbers = #tpu.dot_dimension_numbers<[1], [1], [0], [0], [0, 0, 1, 0], [], []>} : vector<16x64xbf16>, vector<32x64xbf16>, vector<16x32xf32> -> vector<16x32xf32>
    %148 = vector.extract_strided_slice %0 {offsets = [7, 0], sizes = [1, 32], strides = [1, 1]} : vector<20x96xf32> to vector<1x32xf32>
    %149 = vector.broadcast %148 : vector<1x32xf32> to vector<16x32xf32>
    %150 = arith.addf %147, %149 : vector<16x32xf32>
    %151 = arith.addf %125, %150 : vector<16x32xf32>
    %152 = vector.extract_strided_slice %0 {offsets = [8, 0], sizes = [1, 32], strides = [1, 1]} : vector<20x96xf32> to vector<1x32xf32>
    %153 = vector.extract_strided_slice %0 {offsets = [9, 0], sizes = [1, 32], strides = [1, 1]} : vector<20x96xf32> to vector<1x32xf32>
    %cst_38 = arith.constant dense<0.000000e+00> : vector<16xf32>
    %154 = vector.multi_reduction <add>, %151, %cst_38 [1] : vector<16x32xf32> to vector<16xf32>
    %155 = vector.shape_cast %154 : vector<16xf32> to vector<16x1xf32>
    %cst_39 = arith.constant 3.200000e+01 : f32
    %156 = vector.broadcast %cst_39 : f32 to vector<16x1xf32>
    %157 = arith.divf %155, %156 : vector<16x1xf32>
    %158 = vector.broadcast %157 : vector<16x1xf32> to vector<16x32xf32>
    %159 = arith.subf %151, %158 : vector<16x32xf32>
    %160 = arith.mulf %159, %159 : vector<16x32xf32>
    %cst_40 = arith.constant dense<0.000000e+00> : vector<16xf32>
    %161 = vector.multi_reduction <add>, %160, %cst_40 [1] : vector<16x32xf32> to vector<16xf32>
    %162 = vector.shape_cast %161 : vector<16xf32> to vector<16x1xf32>
    %cst_41 = arith.constant 3.200000e+01 : f32
    %163 = vector.broadcast %cst_41 : f32 to vector<16x1xf32>
    %164 = arith.divf %162, %163 : vector<16x1xf32>
    %165 = vector.broadcast %157 : vector<16x1xf32> to vector<16x32xf32>
    %166 = arith.subf %151, %165 : vector<16x32xf32>
    %cst_42 = arith.constant 9.99999996E-13 : f32
    %167 = vector.broadcast %cst_42 : f32 to vector<16x1xf32>
    %168 = arith.addf %164, %167 : vector<16x1xf32>
    %169 = math.rsqrt %168 : vector<16x1xf32>
    %170 = vector.broadcast %169 : vector<16x1xf32> to vector<16x32xf32>
    %171 = arith.mulf %166, %170 : vector<16x32xf32>
    %172 = vector.broadcast %152 : vector<1x32xf32> to vector<16x32xf32>
    %173 = arith.mulf %171, %172 : vector<16x32xf32>
    %174 = vector.broadcast %153 : vector<1x32xf32> to vector<16x32xf32>
    %175 = arith.addf %173, %174 : vector<16x32xf32>
    %c1 = arith.constant 1 : index
    %c0_43 = arith.constant 0 : index
    %c0_44 = arith.constant 0 : index
    %176 = vector.load %arg2[%c1, %c0_43, %c0_44] : memref<3x32x256xbf16, #tpu.memory_space<vmem>>, vector<1x32x256xbf16>
    %177 = vector.shape_cast %176 : vector<1x32x256xbf16> to vector<32x256xbf16>
    %178 = vector.extract_strided_slice %177 {offsets = [0, 0], sizes = [32, 96], strides = [1, 1]} : vector<32x256xbf16> to vector<32x96xbf16>
    %179 = arith.truncf %175 : vector<16x32xf32> to vector<16x32xbf16>
    %cst_45 = arith.constant dense<0.000000e+00> : vector<16x96xf32>
    %180 = tpu.matmul %179, %178, %cst_45 {dimension_numbers = #tpu.dot_dimension_numbers<[1], [0], [0], [1], [0, 0, 1, 1], [], []>} : vector<16x32xbf16>, vector<32x96xbf16>, vector<16x96xf32> -> vector<16x96xf32>
    %181 = vector.extract_strided_slice %0 {offsets = [10, 0], sizes = [1, 96], strides = [1, 1]} : vector<20x96xf32> to vector<1x96xf32>
    %182 = vector.broadcast %181 : vector<1x96xf32> to vector<16x96xf32>
    %183 = arith.addf %180, %182 : vector<16x96xf32>
    %184 = arith.truncf %183 : vector<16x96xf32> to vector<16x96xbf16>
    %185 = vector.shape_cast %184 : vector<16x96xbf16> to vector<2x8x96xbf16>
    %186 = vector.extract_strided_slice %185 {offsets = [0, 0, 0], sizes = [2, 8, 8], strides = [1, 1, 1]} : vector<2x8x96xbf16> to vector<2x8x8xbf16>
    %187 = vector.extract_strided_slice %185 {offsets = [0, 0, 32], sizes = [2, 8, 8], strides = [1, 1, 1]} : vector<2x8x96xbf16> to vector<2x8x8xbf16>
    %188 = vector.extract_strided_slice %185 {offsets = [0, 0, 64], sizes = [2, 8, 8], strides = [1, 1, 1]} : vector<2x8x96xbf16> to vector<2x8x8xbf16>
    "tpu.trace_start"() <{level = 10 : i32, message = "bqd,bkd->bqk"}> : () -> ()
    %cst_46 = arith.constant dense<0.000000e+00> : vector<2x8x8xf32>
    %189 = tpu.matmul %186, %187, %cst_46 {dimension_numbers = #tpu.dot_dimension_numbers<[2], [2], [1], [1], [0, 0, 0, 1, 1, 1], [0], [0]>} : vector<2x8x8xbf16>, vector<2x8x8xbf16>, vector<2x8x8xf32> -> vector<2x8x8xf32>
    "tpu.trace_stop"() : () -> ()
    %190 = vector.broadcast %26 : vector<2x1x8xf32> to vector<2x8x8xf32>
    %191 = arith.addf %189, %190 : vector<2x8x8xf32>
    %192 = math.exp %191 : vector<2x8x8xf32>
    %cst_47 = arith.constant dense<0.000000e+00> : vector<2x8xf32>
    %193 = vector.multi_reduction <add>, %192, %cst_47 [2] : vector<2x8x8xf32> to vector<2x8xf32>
    %194 = vector.shape_cast %193 : vector<2x8xf32> to vector<2x8x1xf32>
    %195 = tpu.reciprocal %194 {approx = true} : vector<2x8x1xf32> -> vector<2x8x1xf32>
    %196 = vector.broadcast %195 : vector<2x8x1xf32> to vector<2x8x8xf32>
    %197 = arith.mulf %192, %196 : vector<2x8x8xf32>
    %198 = arith.truncf %197 : vector<2x8x8xf32> to vector<2x8x8xbf16>
    "tpu.trace_start"() <{level = 10 : i32, message = "bqk,bkd->bqd"}> : () -> ()
    %cst_48 = arith.constant dense<0.000000e+00> : vector<2x8x8xf32>
    %199 = tpu.matmul %198, %188, %cst_48 {dimension_numbers = #tpu.dot_dimension_numbers<[2], [1], [1], [2], [0, 0, 0, 1, 1, 2], [0], [0]>} : vector<2x8x8xbf16>, vector<2x8x8xbf16>, vector<2x8x8xf32> -> vector<2x8x8xf32>
    "tpu.trace_stop"() : () -> ()
    %200 = vector.extract_strided_slice %185 {offsets = [0, 0, 8], sizes = [2, 8, 8], strides = [1, 1, 1]} : vector<2x8x96xbf16> to vector<2x8x8xbf16>
    %201 = vector.extract_strided_slice %185 {offsets = [0, 0, 40], sizes = [2, 8, 8], strides = [1, 1, 1]} : vector<2x8x96xbf16> to vector<2x8x8xbf16>
    %202 = vector.extract_strided_slice %185 {offsets = [0, 0, 72], sizes = [2, 8, 8], strides = [1, 1, 1]} : vector<2x8x96xbf16> to vector<2x8x8xbf16>
    "tpu.trace_start"() <{level = 10 : i32, message = "bqd,bkd->bqk"}> : () -> ()
    %cst_49 = arith.constant dense<0.000000e+00> : vector<2x8x8xf32>
    %203 = tpu.matmul %200, %201, %cst_49 {dimension_numbers = #tpu.dot_dimension_numbers<[2], [2], [1], [1], [0, 0, 0, 1, 1, 1], [0], [0]>} : vector<2x8x8xbf16>, vector<2x8x8xbf16>, vector<2x8x8xf32> -> vector<2x8x8xf32>
    "tpu.trace_stop"() : () -> ()
    %204 = vector.broadcast %26 : vector<2x1x8xf32> to vector<2x8x8xf32>
    %205 = arith.addf %203, %204 : vector<2x8x8xf32>
    %206 = math.exp %205 : vector<2x8x8xf32>
    %cst_50 = arith.constant dense<0.000000e+00> : vector<2x8xf32>
    %207 = vector.multi_reduction <add>, %206, %cst_50 [2] : vector<2x8x8xf32> to vector<2x8xf32>
    %208 = vector.shape_cast %207 : vector<2x8xf32> to vector<2x8x1xf32>
    %209 = tpu.reciprocal %208 {approx = true} : vector<2x8x1xf32> -> vector<2x8x1xf32>
    %210 = vector.broadcast %209 : vector<2x8x1xf32> to vector<2x8x8xf32>
    %211 = arith.mulf %206, %210 : vector<2x8x8xf32>
    %212 = arith.truncf %211 : vector<2x8x8xf32> to vector<2x8x8xbf16>
    "tpu.trace_start"() <{level = 10 : i32, message = "bqk,bkd->bqd"}> : () -> ()
    %cst_51 = arith.constant dense<0.000000e+00> : vector<2x8x8xf32>
    %213 = tpu.matmul %212, %202, %cst_51 {dimension_numbers = #tpu.dot_dimension_numbers<[2], [1], [1], [2], [0, 0, 0, 1, 1, 2], [0], [0]>} : vector<2x8x8xbf16>, vector<2x8x8xbf16>, vector<2x8x8xf32> -> vector<2x8x8xf32>
    "tpu.trace_stop"() : () -> ()
    %214 = vector.extract_strided_slice %185 {offsets = [0, 0, 16], sizes = [2, 8, 8], strides = [1, 1, 1]} : vector<2x8x96xbf16> to vector<2x8x8xbf16>
    %215 = vector.extract_strided_slice %185 {offsets = [0, 0, 48], sizes = [2, 8, 8], strides = [1, 1, 1]} : vector<2x8x96xbf16> to vector<2x8x8xbf16>
    %216 = vector.extract_strided_slice %185 {offsets = [0, 0, 80], sizes = [2, 8, 8], strides = [1, 1, 1]} : vector<2x8x96xbf16> to vector<2x8x8xbf16>
    "tpu.trace_start"() <{level = 10 : i32, message = "bqd,bkd->bqk"}> : () -> ()
    %cst_52 = arith.constant dense<0.000000e+00> : vector<2x8x8xf32>
    %217 = tpu.matmul %214, %215, %cst_52 {dimension_numbers = #tpu.dot_dimension_numbers<[2], [2], [1], [1], [0, 0, 0, 1, 1, 1], [0], [0]>} : vector<2x8x8xbf16>, vector<2x8x8xbf16>, vector<2x8x8xf32> -> vector<2x8x8xf32>
    "tpu.trace_stop"() : () -> ()
    %218 = vector.broadcast %26 : vector<2x1x8xf32> to vector<2x8x8xf32>
    %219 = arith.addf %217, %218 : vector<2x8x8xf32>
    %220 = math.exp %219 : vector<2x8x8xf32>
    %cst_53 = arith.constant dense<0.000000e+00> : vector<2x8xf32>
    %221 = vector.multi_reduction <add>, %220, %cst_53 [2] : vector<2x8x8xf32> to vector<2x8xf32>
    %222 = vector.shape_cast %221 : vector<2x8xf32> to vector<2x8x1xf32>
    %223 = tpu.reciprocal %222 {approx = true} : vector<2x8x1xf32> -> vector<2x8x1xf32>
    %224 = vector.broadcast %223 : vector<2x8x1xf32> to vector<2x8x8xf32>
    %225 = arith.mulf %220, %224 : vector<2x8x8xf32>
    %226 = arith.truncf %225 : vector<2x8x8xf32> to vector<2x8x8xbf16>
    "tpu.trace_start"() <{level = 10 : i32, message = "bqk,bkd->bqd"}> : () -> ()
    %cst_54 = arith.constant dense<0.000000e+00> : vector<2x8x8xf32>
    %227 = tpu.matmul %226, %216, %cst_54 {dimension_numbers = #tpu.dot_dimension_numbers<[2], [1], [1], [2], [0, 0, 0, 1, 1, 2], [0], [0]>} : vector<2x8x8xbf16>, vector<2x8x8xbf16>, vector<2x8x8xf32> -> vector<2x8x8xf32>
    "tpu.trace_stop"() : () -> ()
    %228 = vector.extract_strided_slice %185 {offsets = [0, 0, 24], sizes = [2, 8, 8], strides = [1, 1, 1]} : vector<2x8x96xbf16> to vector<2x8x8xbf16>
    %229 = vector.extract_strided_slice %185 {offsets = [0, 0, 56], sizes = [2, 8, 8], strides = [1, 1, 1]} : vector<2x8x96xbf16> to vector<2x8x8xbf16>
    %230 = vector.extract_strided_slice %185 {offsets = [0, 0, 88], sizes = [2, 8, 8], strides = [1, 1, 1]} : vector<2x8x96xbf16> to vector<2x8x8xbf16>
    "tpu.trace_start"() <{level = 10 : i32, message = "bqd,bkd->bqk"}> : () -> ()
    %cst_55 = arith.constant dense<0.000000e+00> : vector<2x8x8xf32>
    %231 = tpu.matmul %228, %229, %cst_55 {dimension_numbers = #tpu.dot_dimension_numbers<[2], [2], [1], [1], [0, 0, 0, 1, 1, 1], [0], [0]>} : vector<2x8x8xbf16>, vector<2x8x8xbf16>, vector<2x8x8xf32> -> vector<2x8x8xf32>
    "tpu.trace_stop"() : () -> ()
    %232 = vector.broadcast %26 : vector<2x1x8xf32> to vector<2x8x8xf32>
    %233 = arith.addf %231, %232 : vector<2x8x8xf32>
    %234 = math.exp %233 : vector<2x8x8xf32>
    %cst_56 = arith.constant dense<0.000000e+00> : vector<2x8xf32>
    %235 = vector.multi_reduction <add>, %234, %cst_56 [2] : vector<2x8x8xf32> to vector<2x8xf32>
    %236 = vector.shape_cast %235 : vector<2x8xf32> to vector<2x8x1xf32>
    %237 = tpu.reciprocal %236 {approx = true} : vector<2x8x1xf32> -> vector<2x8x1xf32>
    %238 = vector.broadcast %237 : vector<2x8x1xf32> to vector<2x8x8xf32>
    %239 = arith.mulf %234, %238 : vector<2x8x8xf32>
    %240 = arith.truncf %239 : vector<2x8x8xf32> to vector<2x8x8xbf16>
    "tpu.trace_start"() <{level = 10 : i32, message = "bqk,bkd->bqd"}> : () -> ()
    %cst_57 = arith.constant dense<0.000000e+00> : vector<2x8x8xf32>
    %241 = tpu.matmul %240, %230, %cst_57 {dimension_numbers = #tpu.dot_dimension_numbers<[2], [1], [1], [2], [0, 0, 0, 1, 1, 2], [0], [0]>} : vector<2x8x8xbf16>, vector<2x8x8xbf16>, vector<2x8x8xf32> -> vector<2x8x8xf32>
    "tpu.trace_stop"() : () -> ()
    %242 = tpu.concatenate %199, %213, %227, %241 in 2 : vector<2x8x8xf32>, vector<2x8x8xf32>, vector<2x8x8xf32>, vector<2x8x8xf32> -> vector<2x8x32xf32>
    %243 = vector.shape_cast %242 : vector<2x8x32xf32> to vector<16x32xf32>
    %244 = vector.extract_strided_slice %177 {offsets = [0, 96], sizes = [32, 32], strides = [1, 1]} : vector<32x256xbf16> to vector<32x32xbf16>
    %245 = arith.truncf %243 : vector<16x32xf32> to vector<16x32xbf16>
    %cst_58 = arith.constant dense<0.000000e+00> : vector<16x32xf32>
    %246 = tpu.matmul %245, %244, %cst_58 {dimension_numbers = #tpu.dot_dimension_numbers<[1], [0], [0], [1], [0, 0, 1, 1], [], []>} : vector<16x32xbf16>, vector<32x32xbf16>, vector<16x32xf32> -> vector<16x32xf32>
    %247 = vector.extract_strided_slice %0 {offsets = [11, 0], sizes = [1, 32], strides = [1, 1]} : vector<20x96xf32> to vector<1x32xf32>
    %248 = vector.broadcast %247 : vector<1x32xf32> to vector<16x32xf32>
    %249 = arith.addf %246, %248 : vector<16x32xf32>
    %250 = arith.addf %175, %249 : vector<16x32xf32>
    %251 = vector.extract_strided_slice %0 {offsets = [12, 0], sizes = [1, 32], strides = [1, 1]} : vector<20x96xf32> to vector<1x32xf32>
    %252 = vector.extract_strided_slice %0 {offsets = [13, 0], sizes = [1, 32], strides = [1, 1]} : vector<20x96xf32> to vector<1x32xf32>
    %cst_59 = arith.constant dense<0.000000e+00> : vector<16xf32>
    %253 = vector.multi_reduction <add>, %250, %cst_59 [1] : vector<16x32xf32> to vector<16xf32>
    %254 = vector.shape_cast %253 : vector<16xf32> to vector<16x1xf32>
    %cst_60 = arith.constant 3.200000e+01 : f32
    %255 = vector.broadcast %cst_60 : f32 to vector<16x1xf32>
    %256 = arith.divf %254, %255 : vector<16x1xf32>
    %257 = vector.broadcast %256 : vector<16x1xf32> to vector<16x32xf32>
    %258 = arith.subf %250, %257 : vector<16x32xf32>
    %259 = arith.mulf %258, %258 : vector<16x32xf32>
    %cst_61 = arith.constant dense<0.000000e+00> : vector<16xf32>
    %260 = vector.multi_reduction <add>, %259, %cst_61 [1] : vector<16x32xf32> to vector<16xf32>
    %261 = vector.shape_cast %260 : vector<16xf32> to vector<16x1xf32>
    %cst_62 = arith.constant 3.200000e+01 : f32
    %262 = vector.broadcast %cst_62 : f32 to vector<16x1xf32>
    %263 = arith.divf %261, %262 : vector<16x1xf32>
    %264 = vector.broadcast %256 : vector<16x1xf32> to vector<16x32xf32>
    %265 = arith.subf %250, %264 : vector<16x32xf32>
    %cst_63 = arith.constant 9.99999996E-13 : f32
    %266 = vector.broadcast %cst_63 : f32 to vector<16x1xf32>
    %267 = arith.addf %263, %266 : vector<16x1xf32>
    %268 = math.rsqrt %267 : vector<16x1xf32>
    %269 = vector.broadcast %268 : vector<16x1xf32> to vector<16x32xf32>
    %270 = arith.mulf %265, %269 : vector<16x32xf32>
    %271 = vector.broadcast %251 : vector<1x32xf32> to vector<16x32xf32>
    %272 = arith.mulf %270, %271 : vector<16x32xf32>
    %273 = vector.broadcast %252 : vector<1x32xf32> to vector<16x32xf32>
    %274 = arith.addf %272, %273 : vector<16x32xf32>
    %275 = vector.extract_strided_slice %177 {offsets = [0, 128], sizes = [32, 64], strides = [1, 1]} : vector<32x256xbf16> to vector<32x64xbf16>
    %276 = arith.truncf %274 : vector<16x32xf32> to vector<16x32xbf16>
    %cst_64 = arith.constant dense<0.000000e+00> : vector<16x64xf32>
    %277 = tpu.matmul %276, %275, %cst_64 {dimension_numbers = #tpu.dot_dimension_numbers<[1], [0], [0], [1], [0, 0, 1, 1], [], []>} : vector<16x32xbf16>, vector<32x64xbf16>, vector<16x64xf32> -> vector<16x64xf32>
    %278 = vector.extract_strided_slice %0 {offsets = [14, 0], sizes = [1, 64], strides = [1, 1]} : vector<20x96xf32> to vector<1x64xf32>
    %279 = vector.broadcast %278 : vector<1x64xf32> to vector<16x64xf32>
    %280 = arith.addf %277, %279 : vector<16x64xf32>
    %cst_65 = arith.constant 5.000000e-01 : f32
    %281 = vector.broadcast %cst_65 : f32 to vector<16x64xf32>
    %282 = arith.mulf %281, %280 : vector<16x64xf32>
    %cst_66 = arith.constant 4.471500e-02 : f32
    %283 = vector.broadcast %cst_66 : f32 to vector<16x64xf32>
    %284 = arith.mulf %283, %280 : vector<16x64xf32>
    %285 = arith.mulf %284, %280 : vector<16x64xf32>
    %286 = arith.mulf %285, %280 : vector<16x64xf32>
    %287 = arith.addf %280, %286 : vector<16x64xf32>
    %cst_67 = arith.constant 0.797884583 : f32
    %288 = vector.broadcast %cst_67 : f32 to vector<16x64xf32>
    %289 = arith.mulf %288, %287 : vector<16x64xf32>
    %290 = math.tanh %289 : vector<16x64xf32>
    %cst_68 = arith.constant 1.000000e+00 : f32
    %291 = vector.broadcast %cst_68 : f32 to vector<16x64xf32>
    %292 = arith.addf %291, %290 : vector<16x64xf32>
    %293 = arith.mulf %282, %292 : vector<16x64xf32>
    %294 = arith.truncf %293 : vector<16x64xf32> to vector<16x64xbf16>
    %295 = vector.extract_strided_slice %177 {offsets = [0, 192], sizes = [32, 64], strides = [1, 1]} : vector<32x256xbf16> to vector<32x64xbf16>
    %cst_69 = arith.constant dense<0.000000e+00> : vector<16x32xf32>
    %296 = tpu.matmul %294, %295, %cst_69 {dimension_numbers = #tpu.dot_dimension_numbers<[1], [1], [0], [0], [0, 0, 1, 0], [], []>} : vector<16x64xbf16>, vector<32x64xbf16>, vector<16x32xf32> -> vector<16x32xf32>
    %297 = vector.extract_strided_slice %0 {offsets = [15, 0], sizes = [1, 32], strides = [1, 1]} : vector<20x96xf32> to vector<1x32xf32>
    %298 = vector.broadcast %297 : vector<1x32xf32> to vector<16x32xf32>
    %299 = arith.addf %296, %298 : vector<16x32xf32>
    %300 = arith.addf %274, %299 : vector<16x32xf32>
    %301 = vector.extract_strided_slice %0 {offsets = [16, 0], sizes = [1, 32], strides = [1, 1]} : vector<20x96xf32> to vector<1x32xf32>
    %302 = vector.extract_strided_slice %0 {offsets = [17, 0], sizes = [1, 32], strides = [1, 1]} : vector<20x96xf32> to vector<1x32xf32>
    %cst_70 = arith.constant dense<0.000000e+00> : vector<16xf32>
    %303 = vector.multi_reduction <add>, %300, %cst_70 [1] : vector<16x32xf32> to vector<16xf32>
    %304 = vector.shape_cast %303 : vector<16xf32> to vector<16x1xf32>
    %cst_71 = arith.constant 3.200000e+01 : f32
    %305 = vector.broadcast %cst_71 : f32 to vector<16x1xf32>
    %306 = arith.divf %304, %305 : vector<16x1xf32>
    %307 = vector.broadcast %306 : vector<16x1xf32> to vector<16x32xf32>
    %308 = arith.subf %300, %307 : vector<16x32xf32>
    %309 = arith.mulf %308, %308 : vector<16x32xf32>
    %cst_72 = arith.constant dense<0.000000e+00> : vector<16xf32>
    %310 = vector.multi_reduction <add>, %309, %cst_72 [1] : vector<16x32xf32> to vector<16xf32>
    %311 = vector.shape_cast %310 : vector<16xf32> to vector<16x1xf32>
    %cst_73 = arith.constant 3.200000e+01 : f32
    %312 = vector.broadcast %cst_73 : f32 to vector<16x1xf32>
    %313 = arith.divf %311, %312 : vector<16x1xf32>
    %314 = vector.broadcast %306 : vector<16x1xf32> to vector<16x32xf32>
    %315 = arith.subf %300, %314 : vector<16x32xf32>
    %cst_74 = arith.constant 9.99999996E-13 : f32
    %316 = vector.broadcast %cst_74 : f32 to vector<16x1xf32>
    %317 = arith.addf %313, %316 : vector<16x1xf32>
    %318 = math.rsqrt %317 : vector<16x1xf32>
    %319 = vector.broadcast %318 : vector<16x1xf32> to vector<16x32xf32>
    %320 = arith.mulf %315, %319 : vector<16x32xf32>
    %321 = vector.broadcast %301 : vector<1x32xf32> to vector<16x32xf32>
    %322 = arith.mulf %320, %321 : vector<16x32xf32>
    %323 = vector.broadcast %302 : vector<1x32xf32> to vector<16x32xf32>
    %324 = arith.addf %322, %323 : vector<16x32xf32>
    %c2 = arith.constant 2 : index
    %c0_75 = arith.constant 0 : index
    %c0_76 = arith.constant 0 : index
    %325 = vector.load %arg2[%c2, %c0_75, %c0_76] : memref<3x32x256xbf16, #tpu.memory_space<vmem>>, vector<1x32x256xbf16>
    %326 = vector.shape_cast %325 : vector<1x32x256xbf16> to vector<32x256xbf16>
    %327 = vector.shape_cast %324 : vector<16x32xf32> to vector<2x8x32xf32>
    %328 = vector.extract_strided_slice %327 {offsets = [0, 0, 0], sizes = [2, 1, 32], strides = [1, 1, 1]} : vector<2x8x32xf32> to vector<2x1x32xf32>
    %329 = vector.shape_cast %328 : vector<2x1x32xf32> to vector<2x32xf32>
    %330 = vector.extract_strided_slice %326 {offsets = [0, 0], sizes = [32, 32], strides = [1, 1]} : vector<32x256xbf16> to vector<32x32xbf16>
    %331 = arith.truncf %329 : vector<2x32xf32> to vector<2x32xbf16>
    %cst_77 = arith.constant dense<0.000000e+00> : vector<2x32xf32>
    %332 = tpu.matmul %331, %330, %cst_77 {dimension_numbers = #tpu.dot_dimension_numbers<[1], [0], [0], [1], [0, 0, 1, 1], [], []>} : vector<2x32xbf16>, vector<32x32xbf16>, vector<2x32xf32> -> vector<2x32xf32>
    %333 = vector.extract_strided_slice %0 {offsets = [18, 0], sizes = [1, 32], strides = [1, 1]} : vector<20x96xf32> to vector<1x32xf32>
    %334 = vector.broadcast %333 : vector<1x32xf32> to vector<2x32xf32>
    %335 = arith.addf %332, %334 : vector<2x32xf32>
    %336 = math.tanh %335 : vector<2x32xf32>
    %337 = vector.extract_strided_slice %326 {offsets = [0, 32], sizes = [32, 8], strides = [1, 1]} : vector<32x256xbf16> to vector<32x8xbf16>
    %338 = arith.truncf %336 : vector<2x32xf32> to vector<2x32xbf16>
    %cst_78 = arith.constant dense<0.000000e+00> : vector<2x8xf32>
    %339 = tpu.matmul %338, %337, %cst_78 {dimension_numbers = #tpu.dot_dimension_numbers<[1], [0], [0], [1], [0, 0, 1, 1], [], []>} : vector<2x32xbf16>, vector<32x8xbf16>, vector<2x8xf32> -> vector<2x8xf32>
    %340 = vector.extract_strided_slice %0 {offsets = [19, 0], sizes = [1, 8], strides = [1, 1]} : vector<20x96xf32> to vector<1x8xf32>
    %341 = vector.broadcast %340 : vector<1x8xf32> to vector<2x8xf32>
    %342 = arith.addf %339, %341 : vector<2x8xf32>
    %c0_79 = arith.constant 0 : index
    %c0_80 = arith.constant 0 : index
    %343 = vector.load %arg4[%c0_79, %c0_80] : memref<2x8xf32, #tpu.memory_space<vmem>>, vector<2x8xf32>
    tpu.vector_store %arg4[%c0_79, %c0_80], %342 {strides = array<i32>} : memref<2x8xf32, #tpu.memory_space<vmem>>, vector<2x8xf32>,
    return
  }
}

</mosaic_0001>

<bundles_post_ra>
// kernel: nlp_model_forward.1
= control target key start
LH: loop header
LB: loop body
LE: loop exit
PB: predicated region body
PF: predicated region fallthrough
CT: control target
= control target key end

     0   :  { %vm24_vm0 = vcmask 261120   ;;  %s3921_s0 = inlined_call_operand.vmem [shape: f32[16,32], index: 0, kind: input, shape index: {}]   ;;  %s3922_s1 = inlined_call_operand.vmem [shape: f32[2,1,8], index: 1, kind: input, shape index: {}]   ;;  %s3923_s2 = inlined_call_operand.vmem [shape: bf16[3,32,256], index: 2, kind: input, shape index: {}]   ;;  %s3924_s3 = inlined_call_operand.vmem [shape: f32[20,96], index: 3, kind: input, shape index: {}]   ;;  %s3925_s4 = inlined_call_operand.hbm [shape: f32[2,8], index: 4, kind: output, shape index: {}]  }
   0x1   :  { %v22_v0 = vld [vmem:[%s3921_s0] sm:$0xff]  ;;  %v23_v1 = vld [vmem:[%s3921_s0 + $0x8] sm:$0xff] }
   0x2   :  { %v25_v2 = vsel %vm24_vm0, %v22_v0, 0.0  ;;  %v28_v3 = vsel %vm24_vm0, %v23_v1, 0.0 }
   0x3   :  { %26 = vadd.xlane.f32.xlu0 %v25_v2 }
   0x4   :  { %9 = vsyncpa [#allocation3], 0  ;;  %v3331_v14 = vld [vmem:[%s3923_s2] ss:$8 sps:$4 sm:$0xff]   ;;  %v3275_v15 = vmov 0.0   ;;  %vm3276_vm1 = vmmov 0   ;;  %v52_v21 = vlaneseq }
   0x5   :  { %2821 = vmatprep.subr.bf16.mxu0 %v3275_v15  ;;  %2829 = vmatprep.subr.bf16.mxu1 %v3275_v15  ;;  %v3339_v16 = vld [vmem:[%s3923_s2 + $0x10] ss:$8 sps:$4 sm:$0xff]   ;;  %v3356_v26 = vld [vmem:[%s3924_s3] sm:$0xff]  ;;  %s3277_s24 = smov 96   ;;  %vm151_vm2 = vcmask 64512   ;;  %s3278_s29 = smov 64  }
   0x6   :  { %2822 = vmatpush3.bf16.msra.mxu0 %v3331_v14  ;;  %2825 = vmatprep.mubr.msk.bf16.mxu0 %vm3276_vm1, %v3275_v15  ;;  %v3348_v24 = vshrl.u32 %v52_v21, 7  ;;  %v3402_v53 = vld [vmem:[%s3922_s1] ss:$0 sm:$0xff]  ;;  %v3407_v55 = vld [vmem:[%s3922_s1 + $0x1] ss:$0 sm:$0xff]  ;;  %s3279_s30 = smov 88  }
   0x7   :  { %29 = vadd.xlane.f32.xlu0 %v28_v3  ;;  %2823 = vmatprep.subr.bf16.mxu0 %v3275_v15  ;;  %s3280_s5 = smov 120   ;;  %s3281_s6 = smov 56   ;;  %vm267_vm3 = vcmask 1043456   ;;  %vm1021_vm4 = vcmask 130048   ;;  %vm1024_vm5 = vcmask 195584   ;;  %vm1206_vm6 = vcmask 523264  }
   0x8   :  { %2831 = vmatprep.mubr.msk.bf16.mxu1 %vm3276_vm1, %v3275_v15  ;;  %v3351_v25 = vsub.s32 0, %v3348_v24  ;;  %v3361_v30 = vsub.s32 1, %v3348_v24  ;;  %v3375_v39 = vsub.s32 2, %v3348_v24  ;;  %s3282_s7 = smov 80   ;;  %s3283_s8 = smov 112   ;;  %vm2528_vm7 = vcmask 1041409  }
   0x9   :  { %s3284_s9 = smov 48   ;;  %s3285_s10 = smov 72   ;;  %vm2641_vm8 = vcmask 58368  }
   0xa   :  { %2824 = vmatpush3.bf16.msra.mxu0 %v3339_v16  ;;  %v55_v29 = vrot.slane %v3356_v26, %v3351_v25  ;;  %v61_v34 = vrot.slane %v3356_v26, %v3361_v30  ;;  %v74_v40 = vrot.slane %v3356_v26, %v3375_v39  ;;  %s3286_s11 = smov 104   ;;  %s3287_s12 = smov 40  }
   0xb   :  { %2835 = vmatprep.subr.bf16.mxu0 %v3275_v15  ;;  %s3288_s13 = smov 8   ;;  %s3289_s14 = smov 32  }
   0xc   :  { %s3290_s15 = smov 16   ;;  %s3291_s19 = smov 24  }
  0x90   :  { %v27_v4 = vpop.xlane.xlu0 %26 }
  0x91   :  { %v32_v5 = vmul.f32 0.03125, %v27_v4 }
  0x93   :  { %v34_v6 = vsub.f32 %v22_v0, %v32_v5 }
  0x94   :  { %v30_v7 = vpop.xlane.xlu0 %29 }
  0x95   :  { %v33_v8 = vmul.f32 0.03125, %v30_v7  ;;  %v36_v9 = vmul.f32 %v34_v6, %v34_v6 }
  0x97   :  { %v35_v10 = vsub.f32 %v23_v1, %v33_v8  ;;  %v38_v11 = vsel %vm24_vm0, %v36_v9, 0.0 }
  0x98   :  { %39 = vadd.xlane.f32.xlu1 %v38_v11 }
  0x99   :  { %v37_v12 = vmul.f32 %v35_v10, %v35_v10 }
  0x9b   :  { %v41_v13 = vsel %vm24_vm0, %v37_v12, 0.0 }
  0x9c   :  { %42 = vadd.xlane.f32.xlu1 %v41_v13 }
 0x125   :  { %v40_v17 = vpop.xlane.xlu1 %39 }
 0x126   :  { %v44_v18 = vmul.f32 0.03125, %v40_v17 }
 0x128   :  { %v46_v19 = vadd.f32 1e-12, %v44_v18 }
 0x129   :  { %v43_v20 = vpop.xlane.xlu1 %42 }
 0x12a   :  { %3155 = vrsqrt.f32 %v46_v19  ;;  %v45_v22 = vmul.f32 0.03125, %v43_v20 }
 0x12c   :  { %v47_v23 = vadd.f32 1e-12, %v45_v22 }
 0x12e   :  { %3157 = vrsqrt.f32 %v47_v23 }
 0x134   :  { %v3156_v27 = vpop.eup %3155 }
 0x135   :  { %v50_v28 = vmul.f32 %v3156_v27, %v34_v6 }
 0x137   :  { %v56_v33 = vmul.f32 %v55_v29, %v50_v28 }
 0x138   :  { %v3158_v31 = vpop.eup %3157 }
 0x139   :  { %v51_v32 = vmul.f32 %v3158_v31, %v35_v10  ;;  %v3365_v36 = vadd.f32 %v61_v34, %v56_v33 }
 0x13b   :  { %v57_v35 = vmul.f32 %v55_v29, %v51_v32 }
 0x13d   :  { %v3367_v37 = vadd.f32 %v61_v34, %v57_v35 }
 0x13f   :  { %v70_v38 = vpack.c.bf16 %v3367_v37, %v3365_v36 }
 0x141   :  { %2826 = vmatmul.mubr.msk.bf16.vlgmr.msra.gmra.mrb[0].mxu0 %vm24_vm0, %v70_v38 }
 0x142   :  { %2837 = vmatprep.mubr.msk.bf16.mxu0 %vm3276_vm1, %v3275_v15 }
 0x214   :  { %v124_v41 = vpop.f32.mrb[0].mxu0 }
 0x215   :  { %v125_v42 = vadd.f32 %v124_v41, %v74_v40  ;;  %v2827_v43 = vpop.f32.mrb[1].mxu0 }
 0x216   :  { %v127_v44 = vpop.f32.mrb[2].mxu0 }
 0x217   :  { %v3379_v45 = vpack.c.bf16 %v125_v42, %v125_v42  ;;  %v128_v46 = vadd.f32 %v127_v44, %v74_v40  ;;  %v2828_v47 = vpop.f32.mrb[3].mxu0 }
 0x219   :  { %v3381_v48 = vpack.c.bf16 %v128_v46, %v128_v46  ;;  %149 = vrot.lane.b32.xlu0 %v3379_v45, %s3277_s24 }
 0x21b   :  { %198 = vrot.lane.b32.xlu1 %v3381_v48, %s3277_s24 }
 0x28b   :  { %v150_v49 = vpop.permute.xlu0 %149 }
 0x28c   :  { %v156_v50 = vsel %vm151_vm2, %v150_v49, 0 }
 0x28d   :  { %2830 = vmatpush3.bf16.xpose.msra.mxu1 %v156_v50  ;;  %v199_v51 = vpop.permute.xlu1 %198 }
 0x28e   :  { %v204_v52 = vsel %vm151_vm2, %v199_v51, 0  ;;  %2841 = vmatprep.subr.bf16.mxu1 %v3275_v15 }
 0x28f   :  { %2836 = vmatpush3.bf16.xpose.msra.mxu0 %v204_v52 }
 0x290   :  { %2847 = vmatprep.subr.bf16.mxu0 %v3275_v15 }
 0x294   :  { %2832 = vmatmul.mubr.msk.bf16.vlgmr.msra.gmra.mrb[0].mxu1 %vm151_vm2, %v3379_v45 }
 0x295   :  { %2843 = vmatprep.mubr.msk.bf16.mxu1 %vm3276_vm1, %v3275_v15 }
 0x296   :  { %2838 = vmatmul.mubr.msk.bf16.vlgmr.msra.gmra.mrb[4].mxu0 %vm151_vm2, %v3381_v48 }
 0x297   :  { %2849 = vmatprep.mubr.msk.bf16.mxu0 %vm3276_vm1, %v3275_v15 }
 0x367   :  { %v192_v54 = vpop.f32.mrb[0].mxu1 }
 0x368   :  { %v193_v56 = vadd.f32 %v3402_v53, %v192_v54  ;;  %v2833_v57 = vpop.f32.mrb[1].mxu1 }
 0x369   :  { %v195_v58 = vpop.f32.mrb[2].mxu1  ;;  %v240_v59 = vpop.f32.mrb[4].mxu0 }
 0x36a   :  { %v246_v60 = vmul.f32 1.442695, %v193_v56  ;;  %v241_v61 = vadd.f32 %v3407_v55, %v240_v59  ;;  %v2834_v62 = vpop.f32.mrb[3].mxu1  ;;  %v2839_v63 = vpop.f32.mrb[5].mxu0 }
 0x36b   :  { %v243_v0 = vpop.f32.mrb[6].mxu0 }
 0x36c   :  { %3159 = vpow2.f32 %v246_v60  ;;  %v248_v1 = vmul.f32 1.442695, %v241_v61  ;;  %v2840_v2 = vpop.f32.mrb[7].mxu0 }
 0x36e   :  { %3161 = vpow2.f32 %v248_v1 }
 0x376   :  { %v3160_v3 = vpop.eup %3159 }
 0x377   :  { %v250_v4 = vsel %vm151_vm2, %v3160_v3, 0.0 }
 0x378   :  { %v3162_v5 = vpop.eup %3161  ;;  %251 = vadd.xlane.f32.xlu1 %v250_v4 }
 0x379   :  { %v253_v6 = vsel %vm151_vm2, %v3162_v5, 0.0 }
 0x37a   :  { %254 = vadd.xlane.f32.xlu0 %v253_v6 }
 0x389   :  { %311 = vrot.lane.b32.xlu1 %v3381_v48, %s3278_s29 }
 0x38d   :  { %361 = vrot.lane.b32.xlu1 %v3379_v45, %s3279_s30 }
 0x390   :  { %262 = vrot.lane.b32.xlu0 %v3379_v45, %s3278_s29 }
 0x391   :  { %411 = vrot.lane.b32.xlu1 %v3381_v48, %s3279_s30 }
 0x394   :  { %359 = vrot.lane.b32.xlu0 %v3379_v45, %s3280_s5 }
 0x395   :  { %409 = vrot.lane.b32.xlu1 %v3381_v48, %s3280_s5 }
 0x398   :  { %475 = vrot.lane.b32.xlu0 %v3379_v45, %s3281_s6 }
 0x399   :  { %523 = vrot.lane.b32.xlu1 %v3381_v48, %s3281_s6 }
 0x405   :  { %v252_v7 = vpop.xlane.xlu1 %251 }
 0x406   :  { %3163 = vrcp.f32 %v252_v7 }
 0x407   :  { %v255_v8 = vpop.xlane.xlu0 %254 }
 0x408   :  { %3165 = vrcp.f32 %v255_v8 }
 0x409   :  { %v312_v9 = vpop.permute.xlu1 %311 }
 0x40a   :  { %v317_v10 = vsel %vm267_vm3, %v312_v9, 0 }
 0x40b   :  { %2848 = vmatpush3.bf16.msra.mxu0 %v317_v10  ;;  %v263_v11 = vpop.permute.xlu0 %262 }
 0x40c   :  { %v269_v12 = vsel %vm267_vm3, %v263_v11, 0  ;;  %2859 = vmatprep.subr.bf16.mxu0 %v3275_v15 }
 0x40d   :  { %v362_v13 = vpop.permute.xlu1 %361  ;;  %2842 = vmatpush3.bf16.msra.mxu1 %v269_v12 }
 0x40e   :  { %2853 = vmatprep.subr.bf16.mxu1 %v3275_v15  ;;  %v367_v27 = vsel %vm151_vm2, %v362_v13, 0 }
 0x40f   :  { %v360_v23 = vpop.permute.xlu0 %359 }
 0x410   :  { %v3164_v17 = vpop.eup %3163 }
 0x411   :  { %v258_v18 = vmul.f32 %v3164_v17, %v3160_v3  ;;  %v412_v19 = vpop.permute.xlu1 %411 }
 0x412   :  { %v3166_v20 = vpop.eup %3165  ;;  %v417_v31 = vsel %vm151_vm2, %v412_v19, 0 }
 0x413   :  { %v259_v21 = vmul.f32 %v3166_v20, %v3162_v5  ;;  %v260_v22 = vpack.c.bf16 %v258_v18, %v258_v18  ;;  %v476_v32 = vpop.permute.xlu0 %475 }
 0x414   :  { %v481_v34 = vsel %vm267_vm3, %v476_v32, 0 }
 0x415   :  { %2844 = vmatmul.mubr.msk.bf16.vlgmr.msra.gmra.mrb[4].mxu1 %vm151_vm2, %v260_v22  ;;  %v261_v28 = vpack.c.bf16 %v259_v21, %v259_v21  ;;  %v410_v29 = vpop.permute.xlu1 %409 }
 0x416   :  { %2854 = vmatpush3.bf16.xpose.msra.mxu1 %v367_v27  ;;  %2855 = vmatprep.mubr.msk.bf16.mxu1 %vm3276_vm1, %v3275_v15 }
 0x417   :  { %2850 = vmatmul.mubr.msk.bf16.vlgmr.msra.gmra.mrb[8].mxu0 %vm151_vm2, %v261_v28  ;;  %2865 = vmatprep.subr.bf16.mxu1 %v3275_v15 }
 0x418   :  { %2860 = vmatpush3.bf16.xpose.msra.mxu0 %v417_v31  ;;  %2861 = vmatprep.mubr.msk.bf16.mxu0 %vm3276_vm1, %v3275_v15 }
 0x419   :  { %2871 = vmatprep.subr.bf16.mxu0 %v3275_v15  ;;  %v524_v33 = vpop.permute.xlu1 %523 }
 0x41a   :  { %v529_v35 = vsel %vm267_vm3, %v524_v33, 0 }
 0x41d   :  { %2856 = vmatmul.mubr.msk.bf16.vlgmr.msra.gmra.mrb[8].mxu1 %vm151_vm2, %v360_v23 }
 0x41e   :  { %2866 = vmatpush3.bf16.msra.mxu1 %v481_v34  ;;  %2867 = vmatprep.mubr.msk.bf16.mxu1 %vm3276_vm1, %v3275_v15 }
 0x41f   :  { %2862 = vmatmul.mubr.msk.bf16.vlgmr.msra.gmra.mrb[12].mxu0 %vm151_vm2, %v410_v29  ;;  %2877 = vmatprep.subr.bf16.mxu1 %v3275_v15 }
 0x420   :  { %2872 = vmatpush3.bf16.msra.mxu0 %v529_v35  ;;  %2873 = vmatprep.mubr.msk.bf16.mxu0 %vm3276_vm1, %v3275_v15 }
 0x421   :  { %2883 = vmatprep.subr.bf16.mxu0 %v3275_v15 }
 0x4e8   :  { %v3453_v38 = vpop.f32.mrb[4].mxu1 }
 0x4e9   :  { %v2845_v40 = vpop.f32.mrb[5].mxu1 }
 0x4ea   :  { %v308_v41 = vpop.f32.mrb[6].mxu1  ;;  %v3455_v42 = vpop.f32.mrb[8].mxu0 }
 0x4eb   :  { %v2846_v43 = vpop.f32.mrb[7].mxu1  ;;  %v2851_v44 = vpop.f32.mrb[9].mxu0 }
 0x4ec   :  { %v356_v46 = vpop.f32.mrb[10].mxu0 }
 0x4ed   :  { %v2852_v47 = vpop.f32.mrb[11].mxu0 }
 0x4f0   :  { %v403_v49 = vpop.f32.mrb[8].mxu1 }
 0x4f1   :  { %v404_v50 = vadd.f32 %v3402_v53, %v403_v49  ;;  %v2857_v51 = vpop.f32.mrb[9].mxu1 }
 0x4f2   :  { %v406_v52 = vpop.f32.mrb[10].mxu1  ;;  %v453_v54 = vpop.f32.mrb[12].mxu0 }
 0x4f3   :  { %v459_v56 = vmul.f32 1.442695, %v404_v50  ;;  %v454_v57 = vadd.f32 %v3407_v55, %v453_v54  ;;  %v2858_v58 = vpop.f32.mrb[11].mxu1  ;;  %v2863_v59 = vpop.f32.mrb[13].mxu0 }
 0x4f4   :  { %v456_v60 = vpop.f32.mrb[14].mxu0 }
 0x4f5   :  { %3167 = vpow2.f32 %v459_v56  ;;  %v461_v61 = vmul.f32 1.442695, %v454_v57  ;;  %v2864_v62 = vpop.f32.mrb[15].mxu0 }
 0x4f7   :  { %3169 = vpow2.f32 %v461_v61 }
 0x4ff   :  { %v3168_v63 = vpop.eup %3167 }
 0x500   :  { %v463_v0 = vsel %vm151_vm2, %v3168_v63, 0.0 }
 0x501   :  { %v3170_v1 = vpop.eup %3169  ;;  %464 = vadd.xlane.f32.xlu0 %v463_v0 }
 0x502   :  { %v466_v2 = vsel %vm151_vm2, %v3170_v1, 0.0 }
 0x503   :  { %467 = vadd.xlane.f32.xlu1 %v466_v2 }
 0x514   :  { %623 = vrot.lane.b32.xlu1 %v3381_v48, %s3282_s7 }
 0x517   :  { %573 = vrot.lane.b32.xlu0 %v3379_v45, %s3282_s7 }
 0x518   :  { %621 = vrot.lane.b32.xlu1 %v3381_v48, %s3283_s8 }
 0x51b   :  { %571 = vrot.lane.b32.xlu0 %v3379_v45, %s3283_s8 }
 0x51c   :  { %735 = vrot.lane.b32.xlu1 %v3381_v48, %s3284_s9 }
 0x51f   :  { %687 = vrot.lane.b32.xlu0 %v3379_v45, %s3284_s9 }
 0x58e   :  { %v465_v3 = vpop.xlane.xlu0 %464 }
 0x58f   :  { %3171 = vrcp.f32 %v465_v3 }
 0x590   :  { %v468_v4 = vpop.xlane.xlu1 %467 }
 0x591   :  { %3173 = vrcp.f32 %v468_v4 }
 0x592   :  { %v574_v5 = vpop.permute.xlu0 %573 }
 0x593   :  { %v579_v13 = vsel %vm151_vm2, %v574_v5, 0 }
 0x594   :  { %v624_v7 = vpop.permute.xlu1 %623 }
 0x595   :  { %v629_v19 = vsel %vm151_vm2, %v624_v7, 0 }
 0x596   :  { %v572_v12 = vpop.permute.xlu0 %571 }
 0x598   :  { %v622_v18 = vpop.permute.xlu1 %621 }
 0x599   :  { %v3172_v6 = vpop.eup %3171 }
 0x59a   :  { %v471_v8 = vmul.f32 %v3172_v6, %v3168_v63  ;;  %v688_v20 = vpop.permute.xlu0 %687 }
 0x59b   :  { %v3174_v9 = vpop.eup %3173  ;;  %v693_v22 = vsel %vm267_vm3, %v688_v20, 0 }
 0x59c   :  { %v472_v10 = vmul.f32 %v3174_v9, %v3170_v1  ;;  %v473_v11 = vpack.c.bf16 %v471_v8, %v471_v8  ;;  %v736_v21 = vpop.permute.xlu1 %735 }
 0x59d   :  { %v741_v23 = vsel %vm267_vm3, %v736_v21, 0 }
 0x59e   :  { %2868 = vmatmul.mubr.msk.bf16.vlgmr.msra.gmra.mrb[12].mxu1 %vm151_vm2, %v473_v11  ;;  %v474_v17 = vpack.c.bf16 %v472_v10, %v472_v10 }
 0x59f   :  { %2878 = vmatpush3.bf16.xpose.msra.mxu1 %v579_v13  ;;  %2879 = vmatprep.mubr.msk.bf16.mxu1 %vm3276_vm1, %v3275_v15 }
 0x5a0   :  { %2874 = vmatmul.mubr.msk.bf16.vlgmr.msra.gmra.mrb[16].mxu0 %vm151_vm2, %v474_v17  ;;  %2889 = vmatprep.subr.bf16.mxu1 %v3275_v15 }
 0x5a1   :  { %2884 = vmatpush3.bf16.xpose.msra.mxu0 %v629_v19  ;;  %2885 = vmatprep.mubr.msk.bf16.mxu0 %vm3276_vm1, %v3275_v15 }
 0x5a2   :  { %2895 = vmatprep.subr.bf16.mxu0 %v3275_v15 }
 0x5a6   :  { %2880 = vmatmul.mubr.msk.bf16.vlgmr.msra.gmra.mrb[16].mxu1 %vm151_vm2, %v572_v12 }
 0x5a7   :  { %2890 = vmatpush3.bf16.msra.mxu1 %v693_v22  ;;  %2891 = vmatprep.mubr.msk.bf16.mxu1 %vm3276_vm1, %v3275_v15 }
 0x5a8   :  { %2886 = vmatmul.mubr.msk.bf16.vlgmr.msra.gmra.mrb[20].mxu0 %vm151_vm2, %v622_v18  ;;  %2901 = vmatprep.subr.bf16.mxu1 %v3275_v15 }
 0x5a9   :  { %2896 = vmatpush3.bf16.msra.mxu0 %v741_v23  ;;  %2897 = vmatprep.mubr.msk.bf16.mxu0 %vm3276_vm1, %v3275_v15 }
 0x5aa   :  { %2907 = vmatprep.subr.bf16.mxu0 %v3275_v15 }
 0x671   :  { %v3493_v27 = vpop.f32.mrb[12].mxu1 }
 0x672   :  { %v2869_v28 = vpop.f32.mrb[13].mxu1 }
 0x673   :  { %v520_v29 = vpop.f32.mrb[14].mxu1  ;;  %v3495_v31 = vpop.f32.mrb[16].mxu0 }
 0x674   :  { %v3111_v32 = vpack.i.bf16 %v3495_v31, %v3493_v27  ;;  %v2870_v33 = vpop.f32.mrb[15].mxu1  ;;  %v2875_v34 = vpop.f32.mrb[17].mxu0 }
 0x675   :  { %v568_v35 = vpop.f32.mrb[18].mxu0 }
 0x676   :  { %v2876_v40 = vpop.f32.mrb[19].mxu0 }
 0x679   :  { %v615_v41 = vpop.f32.mrb[16].mxu1 }
 0x67a   :  { %v616_v43 = vadd.f32 %v3402_v53, %v615_v41  ;;  %v2881_v44 = vpop.f32.mrb[17].mxu1 }
 0x67b   :  { %v618_v46 = vpop.f32.mrb[18].mxu1  ;;  %v665_v47 = vpop.f32.mrb[20].mxu0 }
 0x67c   :  { %v671_v49 = vmul.f32 1.442695, %v616_v43  ;;  %v666_v50 = vadd.f32 %v3407_v55, %v665_v47  ;;  %v2882_v51 = vpop.f32.mrb[19].mxu1  ;;  %v2887_v52 = vpop.f32.mrb[21].mxu0 }
 0x67d   :  { %v668_v54 = vpop.f32.mrb[22].mxu0 }
 0x67e   :  { %3175 = vpow2.f32 %v671_v49  ;;  %v673_v56 = vmul.f32 1.442695, %v666_v50  ;;  %v2888_v57 = vpop.f32.mrb[23].mxu0 }
 0x680   :  { %3177 = vpow2.f32 %v673_v56 }
 0x688   :  { %v3176_v58 = vpop.eup %3175 }
 0x689   :  { %v675_v59 = vsel %vm151_vm2, %v3176_v58, 0.0 }
 0x68a   :  { %v3178_v60 = vpop.eup %3177  ;;  %676 = vadd.xlane.f32.xlu0 %v675_v59 }
 0x68b   :  { %v678_v61 = vsel %vm151_vm2, %v3178_v60, 0.0 }
 0x68c   :  { %679 = vadd.xlane.f32.xlu1 %v678_v61 }
 0x69d   :  { %835 = vrot.lane.b32.xlu1 %v3381_v48, %s3285_s10 }
 0x6a0   :  { %785 = vrot.lane.b32.xlu0 %v3379_v45, %s3285_s10 }
 0x6a1   :  { %833 = vrot.lane.b32.xlu1 %v3381_v48, %s3286_s11 }
 0x6a4   :  { %783 = vrot.lane.b32.xlu0 %v3379_v45, %s3286_s11 }
 0x717   :  { %v677_v62 = vpop.xlane.xlu0 %676 }
 0x718   :  { %3179 = vrcp.f32 %v677_v62 }
 0x719   :  { %v680_v63 = vpop.xlane.xlu1 %679 }
 0x71a   :  { %3181 = vrcp.f32 %v680_v63  ;;  %v3559_v63 = vld [vmem:[%s3923_s2 + $0x14] ss:$8 sps:$4 sm:$0xff]  }
 0x71b   :  { %v786_v3 = vpop.permute.xlu0 %785 }
 0x71c   :  { %v791_v7 = vsel %vm151_vm2, %v786_v3, 0 }
 0x71d   :  { %v836_v6 = vpop.permute.xlu1 %835 }
 0x71e   :  { %v841_v9 = vsel %vm151_vm2, %v836_v6, 0 }
 0x71f   :  { %v784_v10 = vpop.permute.xlu0 %783 }
 0x721   :  { %v834_v11 = vpop.permute.xlu1 %833 }
 0x722   :  { %v3180_v0 = vpop.eup %3179 }
 0x723   :  { %v683_v1 = vmul.f32 %v3180_v0, %v3176_v58 }
 0x724   :  { %v3182_v2 = vpop.eup %3181 }
 0x725   :  { %v684_v4 = vmul.f32 %v3182_v2, %v3178_v60  ;;  %v685_v5 = vpack.c.bf16 %v683_v1, %v683_v1  ;;  %v3143_v60 = vld [vmem:[%s3923_s2 + $0x4] ss:$8 sps:$4 sm:$0xff]  }
 0x727   :  { %2892 = vmatmul.mubr.msk.bf16.vlgmr.msra.gmra.mrb[20].mxu1 %vm151_vm2, %v685_v5  ;;  %v686_v8 = vpack.c.bf16 %v684_v4, %v684_v4 }
 0x728   :  { %2902 = vmatpush3.bf16.xpose.msra.mxu1 %v791_v7  ;;  %2903 = vmatprep.mubr.msk.bf16.mxu1 %vm3276_vm1, %v3275_v15 }
 0x729   :  { %2898 = vmatmul.mubr.msk.bf16.vlgmr.msra.gmra.mrb[24].mxu0 %vm151_vm2, %v686_v8  ;;  %2913 = vmatprep.subr.bf16.mxu1 %v3275_v15 }
 0x72a   :  { %2908 = vmatpush3.bf16.xpose.msra.mxu0 %v841_v9  ;;  %2909 = vmatprep.mubr.msk.bf16.mxu0 %vm3276_vm1, %v3275_v15 }
 0x72b   :  { %2919 = vmatprep.subr.bf16.mxu0 %v3275_v15 }
 0x72f   :  { %2904 = vmatmul.mubr.msk.bf16.vlgmr.msra.gmra.mrb[24].mxu1 %vm151_vm2, %v784_v10 }
 0x730   :  { %2915 = vmatprep.mubr.msk.bf16.mxu1 %vm3276_vm1, %v3275_v15 }
 0x731   :  { %2910 = vmatmul.mubr.msk.bf16.vlgmr.msra.gmra.mrb[28].mxu0 %vm151_vm2, %v834_v11 }
 0x732   :  { %2921 = vmatprep.mubr.msk.bf16.mxu0 %vm3276_vm1, %v3275_v15 }
 0x7fa   :  { %v729_v12 = vpop.f32.mrb[20].mxu1 }
 0x7fb   :  { %v2893_v13 = vpop.f32.mrb[21].mxu1 }
 0x7fc   :  { %v732_v17 = vpop.f32.mrb[22].mxu1  ;;  %v777_v18 = vpop.f32.mrb[24].mxu0 }
 0x7fd   :  { %v3116_v19 = vpack.i.bf16 %v777_v18, %v729_v12  ;;  %v2894_v20 = vpop.f32.mrb[23].mxu1  ;;  %v2899_v21 = vpop.f32.mrb[25].mxu0 }
 0x7fe   :  { %v780_v22 = vpop.f32.mrb[26].mxu0 }
 0x7ff   :  { %v2900_v23 = vpop.f32.mrb[27].mxu0 }
 0x802   :  { %v827_v28 = vpop.f32.mrb[24].mxu1 }
 0x803   :  { %v828_v29 = vadd.f32 %v3402_v53, %v827_v28  ;;  %v2905_v33 = vpop.f32.mrb[25].mxu1 }
 0x804   :  { %v830_v34 = vpop.f32.mrb[26].mxu1  ;;  %v877_v35 = vpop.f32.mrb[28].mxu0 }
 0x805   :  { %v883_v40 = vmul.f32 1.442695, %v828_v29  ;;  %v878_v41 = vadd.f32 %v3407_v55, %v877_v35  ;;  %v2906_v43 = vpop.f32.mrb[27].mxu1  ;;  %v2911_v44 = vpop.f32.mrb[29].mxu0 }
 0x806   :  { %v880_v46 = vpop.f32.mrb[30].mxu0 }
 0x807   :  { %3183 = vpow2.f32 %v883_v40  ;;  %v885_v47 = vmul.f32 1.442695, %v878_v41  ;;  %v2912_v49 = vpop.f32.mrb[31].mxu0 }
 0x809   :  { %3185 = vpow2.f32 %v885_v47 }
 0x811   :  { %v3184_v50 = vpop.eup %3183 }
 0x812   :  { %v887_v51 = vsel %vm151_vm2, %v3184_v50, 0.0 }
 0x813   :  { %v3186_v52 = vpop.eup %3185  ;;  %888 = vadd.xlane.f32.xlu0 %v887_v51 }
 0x814   :  { %v890_v54 = vsel %vm151_vm2, %v3186_v52, 0.0 }
 0x815   :  { %891 = vadd.xlane.f32.xlu1 %v890_v54 }
 0x826   :  { %947 = vrot.lane.b32.xlu1 %v3381_v48, %s3287_s12 }
 0x829   :  { %899 = vrot.lane.b32.xlu0 %v3379_v45, %s3287_s12 }
 0x82a   :  { %3112 = vrot.lane.b32.xlu1 %v3111_v32, %s3288_s13 }
 0x82d   :  { %1032 = vrot.lane.b32.xlu0 %v3331_v14, %s3289_s14 }
 0x831   :  { %3117 = vrot.lane.b32.xlu0 %v3116_v19, %s3290_s15 }
 0x835   :  { %1034 = vrot.lane.b32.xlu0 %v3339_v16, %s3289_s14 }
 0x8a0   :  { %v889_v48 = vpop.xlane.xlu0 %888 }
 0x8a1   :  { %3187 = vrcp.f32 %v889_v48 }
 0x8a2   :  { %v892_v56 = vpop.xlane.xlu1 %891 }
 0x8a3   :  { %3189 = vrcp.f32 %v892_v56 }
 0x8a4   :  { %v900_v45 = vpop.permute.xlu0 %899 }
 0x8a5   :  { %v905_v57 = vsel %vm267_vm3, %v900_v45, 0 }
 0x8a6   :  { %2914 = vmatpush3.bf16.msra.mxu1 %v905_v57  ;;  %v948_v27 = vpop.permute.xlu1 %947 }
 0x8a7   :  { %v953_v31 = vsel %vm267_vm3, %v948_v27, 0  ;;  %2925 = vmatprep.subr.bf16.mxu1 %v3275_v15 }
 0x8a8   :  { %2920 = vmatpush3.bf16.msra.mxu0 %v953_v31  ;;  %v1033_v61 = vpop.permute.xlu0 %1032 }
 0x8a9   :  { %2933 = vmatprep.subr.bf16.mxu0 %v3275_v15 }
 0x8aa   :  { %v3113_v11 = vpop.permute.xlu1 %3112 }
 0x8ab   :  { %v3188_v14 = vpop.eup %3187  ;;  %v3115_v12 = vunpack.i.h.bf16 %v3113_v11  ;;  %v3114_v13 = vunpack.i.l.bf16 %v3113_v11 }
 0x8ac   :  { %v895_v32 = vmul.f32 %v3188_v14, %v3184_v50  ;;  %v3118_v0 = vpop.permute.xlu0 %3117 }
 0x8ad   :  { %v3190_v58 = vpop.eup %3189  ;;  %v3120_v17 = vunpack.i.h.bf16 %v3118_v0  ;;  %v3119_v18 = vunpack.i.l.bf16 %v3118_v0  ;;  %v1020_v19 = vsel %vm151_vm2, %v3455_v42, %v3115_v12  ;;  %v1019_v20 = vsel %vm151_vm2, %v3453_v38, %v3114_v13 }
 0x8ae   :  { %v896_v16 = vmul.f32 %v3190_v58, %v3186_v52  ;;  %v897_v59 = vpack.c.bf16 %v895_v32, %v895_v32  ;;  %v3580_v38 = vsub.s32 3, %v3348_v24 }
 0x8af   :  { %v1022_v28 = vsel %vm1021_vm4, %v1019_v20, %v3119_v18  ;;  %v1023_v29 = vsel %vm1021_vm4, %v1020_v19, %v3120_v17  ;;  %v1125_v18 = vsub.s32 6, %v3348_v24 }
 0x8b0   :  { %2916 = vmatmul.mubr.msk.bf16.vlgmr.msra.gmra.mrb[28].mxu1 %vm151_vm2, %v897_v59  ;;  %v898_v62 = vpack.c.bf16 %v896_v16, %v896_v16  ;;  %v1035_v1 = vpop.permute.xlu0 %1034  ;;  %v1031_v42 = vrot.slane %v3356_v26, %v3580_v38 }
 0x8b1   :  { %2926 = vmatpush3.bf16.msra.mxu1 %v1033_v61  ;;  %2929 = vmatprep.mubr.msk.bf16.mxu1 %vm3276_vm1, %v3275_v15  ;;  %v1126_v19 = vrot.slane %v3356_v26, %v1125_v18 }
 0x8b2   :  { %2922 = vmatmul.mubr.msk.bf16.vlgmr.msra.gmra.mrb[32].mxu0 %vm151_vm2, %v898_v62  ;;  %2927 = vmatprep.subr.bf16.mxu1 %v3275_v15  ;;  %v1112_v62 = vsub.s32 4, %v3348_v24 }
 0x8b3   :  { %2934 = vmatpush3.bf16.msra.mxu0 %v3143_v60  ;;  %2937 = vmatprep.mubr.msk.bf16.mxu0 %vm3276_vm1, %v3275_v15 }
 0x8b4   :  { %2935 = vmatprep.subr.bf16.mxu0 %v3275_v15 }
 0x8b5   :  { %2928 = vmatpush3.bf16.msra.mxu1 %v1035_v1  ;;  %v1113_v1 = vrot.slane %v3356_v26, %v1112_v62 }
 0x8b6   :  { %2941 = vmatprep.subr.bf16.mxu1 %v3275_v15 }
 0x8b7   :  { %2936 = vmatpush3.bf16.msra.mxu0 %v3559_v63 }
 0x8b8   :  { %2949 = vmatprep.subr.bf16.mxu0 %v3275_v15 }
 0x983   :  { %v941_v2 = vpop.f32.mrb[28].mxu1 }
 0x984   :  { %v2917_v3 = vpop.f32.mrb[29].mxu1 }
 0x985   :  { %v944_v4 = vpop.f32.mrb[30].mxu1  ;;  %v989_v5 = vpop.f32.mrb[32].mxu0  ;;  %v1118_v3 = vsub.s32 5, %v3348_v24 }
 0x986   :  { %v3121_v6 = vpack.i.bf16 %v989_v5, %v941_v2  ;;  %v2918_v7 = vpop.f32.mrb[31].mxu1  ;;  %v2923_v8 = vpop.f32.mrb[33].mxu0 }
 0x987   :  { %v992_v9 = vpop.f32.mrb[34].mxu0 }
 0x988   :  { %3122 = vrot.lane.b32.xlu1 %v3121_v6, %s3291_s19  ;;  %v2924_v10 = vpop.f32.mrb[35].mxu0  ;;  %v1119_v6 = vrot.slane %v3356_v26, %v1118_v3 }
 0x9fa   :  { %v3123_v21 = vpop.permute.xlu1 %3122 }
 0x9fb   :  { %v3125_v22 = vunpack.i.h.bf16 %v3123_v21  ;;  %v3124_v23 = vunpack.i.l.bf16 %v3123_v21 }
 0x9fd   :  { %v1026_v33 = vsel %vm1024_vm5, %v1023_v29, %v3125_v22  ;;  %v1025_v34 = vsel %vm1024_vm5, %v1022_v28, %v3124_v23 }
 0x9fe   :  { %v1027_v35 = vpack.c.bf16 %v1026_v33, %v1025_v34 }
 0xa00   :  { %2930 = vmatmul.mubr.msk.bf16.vlgmr.msra.gmra.mrb[32].mxu1 %vm24_vm0, %v1027_v35 }
 0xa01   :  { %2945 = vmatprep.mubr.msk.bf16.mxu1 %vm3276_vm1, %v3275_v15 }
 0xad3   :  { %v1075_v40 = vpop.f32.mrb[32].mxu1 }
 0xad4   :  { %v1076_v41 = vadd.f32 %v1075_v40, %v1031_v42  ;;  %v2931_v43 = vpop.f32.mrb[33].mxu1 }
 0xad5   :  { %v1078_v44 = vpop.f32.mrb[34].mxu1 }
 0xad6   :  { %v1079_v46 = vadd.f32 %v1078_v44, %v1031_v42  ;;  %v2932_v47 = vpop.f32.mrb[35].mxu1  ;;  %v1082_v49 = vadd.f32 %v1076_v41, %v3365_v36 }
 0xad8   :  { %v1084_v50 = vsel %vm24_vm0, %v1082_v49, 0.0  ;;  %v1083_v51 = vadd.f32 %v1079_v46, %v3367_v37 }
 0xad9   :  { %1085 = vadd.xlane.f32.xlu1 %v1084_v50 }
 0xada   :  { %v1087_v52 = vsel %vm24_vm0, %v1083_v51, 0.0 }
 0xadb   :  { %1088 = vadd.xlane.f32.xlu0 %v1087_v52 }
 0xaea   :  { %1202 = vrot.lane.b32.xlu1 %v3143_v60, %s3278_s29 }
 0xb66   :  { %v1086_v54 = vpop.xlane.xlu1 %1085 }
 0xb67   :  { %v1090_v48 = vmul.f32 0.03125, %v1086_v54 }
 0xb68   :  { %v1089_v56 = vpop.xlane.xlu0 %1088 }
 0xb69   :  { %v1092_v45 = vsub.f32 %v1082_v49, %v1090_v48  ;;  %v1091_v57 = vmul.f32 0.03125, %v1089_v56 }
 0xb6a   :  { %v1203_v11 = vpop.permute.xlu1 %1202 }
 0xb6b   :  { %v1093_v27 = vsub.f32 %v1083_v51, %v1091_v57  ;;  %v1094_v31 = vmul.f32 %v1092_v45, %v1092_v45  ;;  %v1211_v12 = vsel %vm1206_vm6, %v1203_v11, 0  ;;  %v3632_v11 = vld [vmem:[%s3923_s2 + $0x30] ss:$8 sps:$4 sm:$0xff]  }
 0xb6c   :  { %2942 = vmatpush3.bf16.xpose.msra.mxu1 %v1211_v12 }
 0xb6d   :  { %v1096_v14 = vsel %vm24_vm0, %v1094_v31, 0.0  ;;  %v1095_v36 = vmul.f32 %v1093_v27, %v1093_v27  ;;  %2943 = vmatprep.subr.bf16.mxu1 %v3275_v15 }
 0xb6e   :  { %1097 = vadd.xlane.f32.xlu0 %v1096_v14 }
 0xb6f   :  { %v1099_v32 = vsel %vm24_vm0, %v1095_v36, 0.0 }
 0xb72   :  { %1100 = vadd.xlane.f32.xlu0 %v1099_v32 }
 0xb88   :  { %1204 = vrot.lane.b32.xlu0 %v3559_v63, %s3278_s29 }
 0xbfb   :  { %v1098_v37 = vpop.xlane.xlu0 %1097 }
 0xbfc   :  { %v1102_v58 = vmul.f32 0.03125, %v1098_v37 }
 0xbfe   :  { %v1104_v16 = vadd.f32 1e-12, %v1102_v58 }
 0xbff   :  { %v1101_v59 = vpop.xlane.xlu0 %1100 }
 0xc00   :  { %3191 = vrsqrt.f32 %v1104_v16  ;;  %v1103_v60 = vmul.f32 0.03125, %v1101_v59 }
 0xc02   :  { %v1105_v61 = vadd.f32 1e-12, %v1103_v60 }
 0xc03   :  { %v1205_v13 = vpop.permute.xlu0 %1204 }
 0xc04   :  { %3193 = vrsqrt.f32 %v1105_v61  ;;  %v1214_v17 = vsel %vm1206_vm6, %v1205_v13, 0 }
 0xc05   :  { %2944 = vmatpush3.bf16.xpose.msra.mxu1 %v1214_v17 }
 0xc06   :  { %2963 = vmatprep.subr.bf16.mxu1 %v3275_v15 }
 0xc0a   :  { %v3192_v0 = vpop.eup %3191 }
 0xc0b   :  { %v1108_v2 = vmul.f32 %v3192_v0, %v1092_v45 }
 0xc0d   :  { %v1114_v63 = vmul.f32 %v1113_v1, %v1108_v2 }
 0xc0e   :  { %v3194_v4 = vpop.eup %3193 }
 0xc0f   :  { %v1109_v5 = vmul.f32 %v3194_v4, %v1093_v27  ;;  %v1120_v8 = vadd.f32 %v1119_v6, %v1114_v63  ;;  %v1200_v27 = vsub.s32 7, %v3348_v24 }
 0xc11   :  { %v1115_v7 = vmul.f32 %v1113_v1, %v1109_v5  ;;  %v1201_v31 = vrot.slane %v3356_v26, %v1200_v27 }
 0xc13   :  { %v1121_v9 = vadd.f32 %v1119_v6, %v1115_v7 }
 0xc15   :  { %v1122_v10 = vpack.c.bf16 %v1121_v9, %v1120_v8 }
 0xc17   :  { %2938 = vmatmul.mubr.msk.bf16.vlgmr.msra.gmra.mrb[36].mxu0 %vm24_vm0, %v1122_v10 }
 0xc18   :  { %2953 = vmatprep.mubr.msk.bf16.mxu0 %vm3276_vm1, %v3275_v15 }
 0xcea   :  { %v1172_v20 = vpop.f32.mrb[36].mxu0 }
 0xceb   :  { %v1173_v21 = vadd.f32 %v1172_v20, %v1126_v19  ;;  %v2939_v22 = vpop.f32.mrb[37].mxu0 }
 0xcec   :  { %v1175_v23 = vpop.f32.mrb[38].mxu0  ;;  %v3640_v22 = vld [vmem:[%s3924_s3 + $0x8] sm:$0xff] }
 0xced   :  { %v1181_v28 = vmul.f32 0.044715, %v1173_v21  ;;  %v1176_v29 = vadd.f32 %v1175_v23, %v1126_v19  ;;  %v2940_v33 = vpop.f32.mrb[39].mxu0  ;;  %v1179_v52 = vmul.f32 0.5, %v1173_v21  ;;  %v1288_v23 = vrot.slane %v3640_v22, %v3351_v25 }
 0xcef   :  { %v1183_v34 = vmul.f32 %v1181_v28, %v1173_v21  ;;  %v1182_v35 = vmul.f32 0.044715, %v1176_v29  ;;  %v1180_v54 = vmul.f32 0.5, %v1176_v29 }
 0xcf1   :  { %v1185_v42 = vmul.f32 %v1183_v34, %v1173_v21  ;;  %v1184_v40 = vmul.f32 %v1182_v35, %v1176_v29 }
 0xcf3   :  { %v1187_v41 = vadd.f32 %v1185_v42, %v1173_v21  ;;  %v1186_v43 = vmul.f32 %v1184_v40, %v1176_v29  ;;  %v1294_v42 = vrot.slane %v3640_v22, %v3361_v30 }
 0xcf5   :  { %v1189_v44 = vmul.f32 0.7978846, %v1187_v41  ;;  %v1188_v46 = vadd.f32 %v1186_v43, %v1176_v29 }
 0xcf7   :  { %3195 = vtanh.f32 %v1189_v44  ;;  %v1190_v47 = vmul.f32 0.7978846, %v1188_v46  ;;  %v1306_v46 = vrot.slane %v3640_v22, %v3375_v39 }
 0xcf9   :  { %3197 = vtanh.f32 %v1190_v47 }
 0xd01   :  { %v3196_v49 = vpop.eup %3195 }
 0xd02   :  { %v1193_v50 = vadd.f32 1.0, %v3196_v49 }
 0xd03   :  { %v3198_v51 = vpop.eup %3197 }
 0xd04   :  { %v1194_v48 = vadd.f32 1.0, %v3198_v51  ;;  %v1195_v56 = vmul.f32 %v1193_v50, %v1179_v52 }
 0xd06   :  { %v1196_v45 = vmul.f32 %v1194_v48, %v1180_v54 }
 0xd08   :  { %v1197_v57 = vpack.c.bf16 %v1196_v45, %v1195_v56 }
 0xd0a   :  { %2946 = vmatmul.mubr.msk.bf16.vlgmr.msra.gmra.mrb[36].mxu1 %vm1206_vm6, %v1197_v57 }
 0xd0b   :  { %2965 = vmatprep.mubr.msk.bf16.mxu1 %vm3276_vm1, %v3275_v15 }
 0xddd   :  { %v1250_v14 = vpop.f32.mrb[36].mxu1 }
 0xdde   :  { %v1251_v36 = vadd.f32 %v1250_v14, %v1201_v31  ;;  %v2947_v32 = vpop.f32.mrb[37].mxu1 }
 0xddf   :  { %v1253_v37 = vpop.f32.mrb[38].mxu1 }
 0xde0   :  { %v1254_v58 = vadd.f32 %v1253_v37, %v1201_v31  ;;  %v2948_v16 = vpop.f32.mrb[39].mxu1  ;;  %v1257_v59 = vadd.f32 %v1251_v36, %v1120_v8 }
 0xde2   :  { %v1259_v60 = vsel %vm24_vm0, %v1257_v59, 0.0  ;;  %v1258_v61 = vadd.f32 %v1254_v58, %v1121_v9  ;;  %v3626_v9 = vld [vmem:[%s3923_s2 + $0x20] ss:$8 sps:$4 sm:$0xff]  }
 0xde3   :  { %1260 = vadd.xlane.f32.xlu1 %v1259_v60  ;;  %2950 = vmatpush3.bf16.msra.mxu0 %v3626_v9 }
 0xde4   :  { %v1262_v0 = vsel %vm24_vm0, %v1258_v61, 0.0  ;;  %2951 = vmatprep.subr.bf16.mxu0 %v3275_v15 }
 0xde5   :  { %1263 = vadd.xlane.f32.xlu0 %v1262_v0 }
 0xde7   :  { %2952 = vmatpush3.bf16.msra.mxu0 %v3632_v11 }
 0xde8   :  { %2957 = vmatprep.subr.bf16.mxu0 %v3275_v15 }
 0xe70   :  { %v1261_v1 = vpop.xlane.xlu1 %1260 }
 0xe71   :  { %v1265_v2 = vmul.f32 0.03125, %v1261_v1 }
 0xe72   :  { %v1264_v4 = vpop.xlane.xlu0 %1263 }
 0xe73   :  { %v1267_v63 = vsub.f32 %v1257_v59, %v1265_v2  ;;  %v1266_v5 = vmul.f32 0.03125, %v1264_v4 }
 0xe75   :  { %v1268_v26 = vsub.f32 %v1258_v61, %v1266_v5  ;;  %v1269_v6 = vmul.f32 %v1267_v63, %v1267_v63 }
 0xe77   :  { %v1271_v7 = vsel %vm24_vm0, %v1269_v6, 0.0  ;;  %v1270_v10 = vmul.f32 %v1268_v26, %v1268_v26 }
 0xe78   :  { %1272 = vadd.xlane.f32.xlu1 %v1271_v7 }
 0xe79   :  { %v1274_v8 = vsel %vm24_vm0, %v1270_v10, 0.0 }
 0xe7a   :  { %1275 = vadd.xlane.f32.xlu0 %v1274_v8 }
 0xf05   :  { %v1273_v12 = vpop.xlane.xlu1 %1272 }
 0xf06   :  { %v1277_v13 = vmul.f32 0.03125, %v1273_v12 }
 0xf07   :  { %v1276_v17 = vpop.xlane.xlu0 %1275 }
 0xf08   :  { %v1279_v19 = vadd.f32 1e-12, %v1277_v13  ;;  %v1278_v20 = vmul.f32 0.03125, %v1276_v17 }
 0xf0a   :  { %3199 = vrsqrt.f32 %v1279_v19  ;;  %v1280_v21 = vadd.f32 1e-12, %v1278_v20 }
 0xf0c   :  { %3201 = vrsqrt.f32 %v1280_v21 }
 0xf14   :  { %v3200_v28 = vpop.eup %3199 }
 0xf15   :  { %v1283_v29 = vmul.f32 %v3200_v28, %v1267_v63 }
 0xf16   :  { %v3202_v33 = vpop.eup %3201 }
 0xf17   :  { %v1289_v34 = vmul.f32 %v1288_v23, %v1283_v29  ;;  %v1284_v35 = vmul.f32 %v3202_v33, %v1268_v26 }
 0xf19   :  { %v1290_v40 = vmul.f32 %v1288_v23, %v1284_v35  ;;  %v3646_v41 = vadd.f32 %v1294_v42, %v1289_v34 }
 0xf1b   :  { %v3648_v43 = vadd.f32 %v1294_v42, %v1290_v40 }
 0xf1d   :  { %v1302_v44 = vpack.c.bf16 %v3648_v43, %v3646_v41 }
 0xf1f   :  { %2954 = vmatmul.mubr.msk.bf16.vlgmr.msra.gmra.mrb[40].mxu0 %vm24_vm0, %v1302_v44 }
 0xf20   :  { %2959 = vmatprep.mubr.msk.bf16.mxu0 %vm3276_vm1, %v3275_v15 }
 0xff2   :  { %v1356_v47 = vpop.f32.mrb[40].mxu0 }
 0xff3   :  { %v1357_v49 = vadd.f32 %v1356_v47, %v1306_v46  ;;  %v2955_v50 = vpop.f32.mrb[41].mxu0 }
 0xff4   :  { %v1359_v51 = vpop.f32.mrb[42].mxu0 }
 0xff5   :  { %v3657_v52 = vpack.c.bf16 %v1357_v49, %v1357_v49  ;;  %v1360_v54 = vadd.f32 %v1359_v51, %v1306_v46  ;;  %v2956_v48 = vpop.f32.mrb[43].mxu0 }
 0xff7   :  { %v3659_v56 = vpack.c.bf16 %v1360_v54, %v1360_v54  ;;  %1369 = vrot.lane.b32.xlu1 %v3657_v52, %s3277_s24 }
 0xff9   :  { %1417 = vrot.lane.b32.xlu0 %v3659_v56, %s3277_s24 }
 0xffb   :  { %1481 = vrot.lane.b32.xlu1 %v3657_v52, %s3278_s29 }
0x1069   :  { %v1370_v45 = vpop.permute.xlu1 %1369 }
0x106a   :  { %v1375_v57 = vsel %vm151_vm2, %v1370_v45, 0 }
0x106b   :  { %2958 = vmatpush3.bf16.xpose.msra.mxu0 %v1375_v57  ;;  %v1418_v31 = vpop.permute.xlu0 %1417 }
0x106c   :  { %v1423_v14 = vsel %vm151_vm2, %v1418_v31, 0  ;;  %2969 = vmatprep.subr.bf16.mxu0 %v3275_v15 }
0x106d   :  { %2964 = vmatpush3.bf16.xpose.msra.mxu1 %v1423_v14  ;;  %v1482_v36 = vpop.permute.xlu1 %1481 }
0x106e   :  { %2975 = vmatprep.subr.bf16.mxu1 %v3275_v15  ;;  %v1487_v32 = vsel %vm267_vm3, %v1482_v36, 0  ;;  %v3728_v36 = vld [vmem:[%s3922_s1] ss:$0 sm:$0xff] }
0x1072   :  { %2960 = vmatmul.mubr.msk.bf16.vlgmr.msra.gmra.mrb[44].mxu0 %vm151_vm2, %v3657_v52 }
0x1073   :  { %2970 = vmatpush3.bf16.msra.mxu0 %v1487_v32  ;;  %2971 = vmatprep.mubr.msk.bf16.mxu0 %vm3276_vm1, %v3275_v15 }
0x1074   :  { %2966 = vmatmul.mubr.msk.bf16.vlgmr.msra.gmra.mrb[40].mxu1 %vm151_vm2, %v3659_v56  ;;  %2981 = vmatprep.subr.bf16.mxu0 %v3275_v15 }
0x1075   :  { %2977 = vmatprep.mubr.msk.bf16.mxu1 %vm3276_vm1, %v3275_v15 }
0x1145   :  { %v1411_v37 = vpop.f32.mrb[44].mxu0 }
0x1146   :  { %v1412_v58 = vadd.f32 %v3402_v53, %v1411_v37  ;;  %v2961_v16 = vpop.f32.mrb[45].mxu0 }
0x1147   :  { %v1414_v59 = vpop.f32.mrb[46].mxu0  ;;  %v1459_v60 = vpop.f32.mrb[40].mxu1 }
0x1148   :  { %v1465_v61 = vmul.f32 1.442695, %v1412_v58  ;;  %v1460_v0 = vadd.f32 %v3407_v55, %v1459_v60  ;;  %v2962_v1 = vpop.f32.mrb[47].mxu0  ;;  %v2967_v2 = vpop.f32.mrb[41].mxu1  ;;  %v3734_v60 = vld [vmem:[%s3922_s1 + $0x1] ss:$0 sm:$0xff] }
0x1149   :  { %v1462_v4 = vpop.f32.mrb[42].mxu1 }
0x114a   :  { %3203 = vpow2.f32 %v1465_v61  ;;  %v1467_v63 = vmul.f32 1.442695, %v1460_v0  ;;  %v2968_v5 = vpop.f32.mrb[43].mxu1 }
0x114c   :  { %3205 = vpow2.f32 %v1467_v63 }
0x1154   :  { %v3204_v26 = vpop.eup %3203 }
0x1155   :  { %v1469_v6 = vsel %vm151_vm2, %v3204_v26, 0.0 }
0x1156   :  { %v3206_v7 = vpop.eup %3205  ;;  %1470 = vadd.xlane.f32.xlu1 %v1469_v6 }
0x1157   :  { %v1472_v53 = vsel %vm151_vm2, %v3206_v7, 0.0 }
0x1158   :  { %1473 = vadd.xlane.f32.xlu0 %v1472_v53 }
0x1167   :  { %1579 = vrot.lane.b32.xlu1 %v3657_v52, %s3279_s30 }
0x116b   :  { %1629 = vrot.lane.b32.xlu1 %v3659_v56, %s3279_s30 }
0x116e   :  { %1529 = vrot.lane.b32.xlu0 %v3659_v56, %s3278_s29 }
0x116f   :  { %1577 = vrot.lane.b32.xlu1 %v3657_v52, %s3280_s5 }
0x1172   :  { %1627 = vrot.lane.b32.xlu0 %v3659_v56, %s3280_s5 }
0x1173   :  { %1741 = vrot.lane.b32.xlu1 %v3659_v56, %s3281_s6 }
0x1176   :  { %1693 = vrot.lane.b32.xlu0 %v3657_v52, %s3281_s6 }
0x11e3   :  { %v1471_v55 = vpop.xlane.xlu1 %1470 }
0x11e4   :  { %3207 = vrcp.f32 %v1471_v55 }
0x11e5   :  { %v1474_v10 = vpop.xlane.xlu0 %1473 }
0x11e6   :  { %3209 = vrcp.f32 %v1474_v10 }
0x11e7   :  { %v1580_v8 = vpop.permute.xlu1 %1579 }
0x11e8   :  { %v1585_v33 = vsel %vm151_vm2, %v1580_v8, 0 }
0x11e9   :  { %v1530_v12 = vpop.permute.xlu0 %1529 }
0x11ea   :  { %v1535_v13 = vsel %vm267_vm3, %v1530_v12, 0 }
0x11eb   :  { %2976 = vmatpush3.bf16.msra.mxu1 %v1535_v13  ;;  %v1630_v19 = vpop.permute.xlu1 %1629 }
0x11ec   :  { %2987 = vmatprep.subr.bf16.mxu1 %v3275_v15  ;;  %v1635_v42 = vsel %vm151_vm2, %v1630_v19, 0 }
0x11ed   :  { %v1628_v29 = vpop.permute.xlu0 %1627 }
0x11ee   :  { %v3208_v17 = vpop.eup %3207 }
0x11ef   :  { %v1477_v20 = vmul.f32 %v3208_v17, %v3204_v26  ;;  %v1578_v35 = vpop.permute.xlu1 %1577 }
0x11f0   :  { %v3210_v21 = vpop.eup %3209 }
0x11f1   :  { %v1478_v23 = vmul.f32 %v3210_v21, %v3206_v7  ;;  %v1479_v28 = vpack.c.bf16 %v1477_v20, %v1477_v20  ;;  %v1694_v40 = vpop.permute.xlu0 %1693 }
0x11f2   :  { %v1699_v46 = vsel %vm267_vm3, %v1694_v40, 0 }
0x11f3   :  { %2972 = vmatmul.mubr.msk.bf16.vlgmr.msra.gmra.mrb[48].mxu0 %vm151_vm2, %v1479_v28  ;;  %v1480_v34 = vpack.c.bf16 %v1478_v23, %v1478_v23  ;;  %v1742_v44 = vpop.permute.xlu1 %1741 }
0x11f4   :  { %2982 = vmatpush3.bf16.xpose.msra.mxu0 %v1585_v33  ;;  %2983 = vmatprep.mubr.msk.bf16.mxu0 %vm3276_vm1, %v3275_v15  ;;  %v1747_v47 = vsel %vm267_vm3, %v1742_v44, 0 }
0x11f5   :  { %2978 = vmatmul.mubr.msk.bf16.vlgmr.msra.gmra.mrb[44].mxu1 %vm151_vm2, %v1480_v34  ;;  %2993 = vmatprep.subr.bf16.mxu0 %v3275_v15 }
0x11f6   :  { %2988 = vmatpush3.bf16.xpose.msra.mxu1 %v1635_v42  ;;  %2989 = vmatprep.mubr.msk.bf16.mxu1 %vm3276_vm1, %v3275_v15 }
0x11f7   :  { %2999 = vmatprep.subr.bf16.mxu1 %v3275_v15 }
0x11fb   :  { %2984 = vmatmul.mubr.msk.bf16.vlgmr.msra.gmra.mrb[52].mxu0 %vm151_vm2, %v1578_v35 }
0x11fc   :  { %2994 = vmatpush3.bf16.msra.mxu0 %v1699_v46  ;;  %2995 = vmatprep.mubr.msk.bf16.mxu0 %vm3276_vm1, %v3275_v15 }
0x11fd   :  { %2990 = vmatmul.mubr.msk.bf16.vlgmr.msra.gmra.mrb[48].mxu1 %vm151_vm2, %v1628_v29  ;;  %3005 = vmatprep.subr.bf16.mxu0 %v3275_v15 }
0x11fe   :  { %3000 = vmatpush3.bf16.msra.mxu1 %v1747_v47  ;;  %3001 = vmatprep.mubr.msk.bf16.mxu1 %vm3276_vm1, %v3275_v15 }
0x11ff   :  { %3011 = vmatprep.subr.bf16.mxu1 %v3275_v15 }
0x12c6   :  { %v3721_v49 = vpop.f32.mrb[48].mxu0 }
0x12c7   :  { %v2973_v50 = vpop.f32.mrb[49].mxu0 }
0x12c8   :  { %v1526_v51 = vpop.f32.mrb[50].mxu0  ;;  %v3723_v54 = vpop.f32.mrb[44].mxu1 }
0x12c9   :  { %v2974_v48 = vpop.f32.mrb[51].mxu0  ;;  %v2979_v45 = vpop.f32.mrb[45].mxu1 }
0x12ca   :  { %v1574_v57 = vpop.f32.mrb[46].mxu1 }
0x12cb   :  { %v2980_v31 = vpop.f32.mrb[47].mxu1 }
0x12ce   :  { %v1621_v14 = vpop.f32.mrb[52].mxu0 }
0x12cf   :  { %v1622_v32 = vadd.f32 %v3728_v36, %v1621_v14  ;;  %v2985_v37 = vpop.f32.mrb[53].mxu0 }
0x12d0   :  { %v1624_v58 = vpop.f32.mrb[54].mxu0  ;;  %v1671_v16 = vpop.f32.mrb[48].mxu1 }
0x12d1   :  { %v1677_v59 = vmul.f32 1.442695, %v1622_v32  ;;  %v1672_v61 = vadd.f32 %v3734_v60, %v1671_v16  ;;  %v2986_v0 = vpop.f32.mrb[55].mxu0  ;;  %v2991_v1 = vpop.f32.mrb[49].mxu1 }
0x12d2   :  { %v1674_v2 = vpop.f32.mrb[50].mxu1 }
0x12d3   :  { %3211 = vpow2.f32 %v1677_v59  ;;  %v1679_v4 = vmul.f32 1.442695, %v1672_v61  ;;  %v2992_v63 = vpop.f32.mrb[51].mxu1 }
0x12d5   :  { %3213 = vpow2.f32 %v1679_v4 }
0x12dd   :  { %v3212_v5 = vpop.eup %3211 }
0x12de   :  { %v1681_v26 = vsel %vm151_vm2, %v3212_v5, 0.0 }
0x12df   :  { %v3214_v6 = vpop.eup %3213  ;;  %1682 = vadd.xlane.f32.xlu1 %v1681_v26 }
0x12e0   :  { %v1684_v7 = vsel %vm151_vm2, %v3214_v6, 0.0 }
0x12e1   :  { %1685 = vadd.xlane.f32.xlu0 %v1684_v7 }
0x12f0   :  { %1791 = vrot.lane.b32.xlu1 %v3657_v52, %s3282_s7 }
0x12f4   :  { %1789 = vrot.lane.b32.xlu1 %v3657_v52, %s3283_s8 }
0x12f7   :  { %1841 = vrot.lane.b32.xlu0 %v3659_v56, %s3282_s7 }
0x12f8   :  { %1953 = vrot.lane.b32.xlu1 %v3659_v56, %s3284_s9 }
0x12fb   :  { %1839 = vrot.lane.b32.xlu0 %v3659_v56, %s3283_s8 }
0x12ff   :  { %1905 = vrot.lane.b32.xlu0 %v3657_v52, %s3284_s9 }
0x136c   :  { %v1683_v53 = vpop.xlane.xlu1 %1682 }
0x136d   :  { %3215 = vrcp.f32 %v1683_v53 }
0x136e   :  { %v1686_v55 = vpop.xlane.xlu0 %1685 }
0x136f   :  { %3217 = vrcp.f32 %v1686_v55 }
0x1370   :  { %v1792_v12 = vpop.permute.xlu1 %1791 }
0x1371   :  { %v1797_v23 = vsel %vm151_vm2, %v1792_v12, 0 }
0x1372   :  { %v1842_v10 = vpop.permute.xlu0 %1841 }
0x1373   :  { %v1847_v33 = vsel %vm151_vm2, %v1842_v10, 0 }
0x1374   :  { %v1790_v29 = vpop.permute.xlu1 %1789 }
0x1376   :  { %v1840_v21 = vpop.permute.xlu0 %1839 }
0x1377   :  { %v3216_v8 = vpop.eup %3215 }
0x1378   :  { %v1689_v13 = vmul.f32 %v3216_v8, %v3212_v5  ;;  %v1954_v35 = vpop.permute.xlu1 %1953 }
0x1379   :  { %v3218_v17 = vpop.eup %3217  ;;  %v1959_v40 = vsel %vm267_vm3, %v1954_v35, 0 }
0x137a   :  { %v1690_v19 = vmul.f32 %v3218_v17, %v3214_v6  ;;  %v1691_v20 = vpack.c.bf16 %v1689_v13, %v1689_v13  ;;  %v1906_v34 = vpop.permute.xlu0 %1905 }
0x137b   :  { %v1911_v42 = vsel %vm267_vm3, %v1906_v34, 0 }
0x137c   :  { %2996 = vmatmul.mubr.msk.bf16.vlgmr.msra.gmra.mrb[56].mxu0 %vm151_vm2, %v1691_v20  ;;  %v1692_v28 = vpack.c.bf16 %v1690_v19, %v1690_v19 }
0x137d   :  { %3006 = vmatpush3.bf16.xpose.msra.mxu0 %v1797_v23  ;;  %3007 = vmatprep.mubr.msk.bf16.mxu0 %vm3276_vm1, %v3275_v15 }
0x137e   :  { %3002 = vmatmul.mubr.msk.bf16.vlgmr.msra.gmra.mrb[52].mxu1 %vm151_vm2, %v1692_v28  ;;  %3017 = vmatprep.subr.bf16.mxu0 %v3275_v15 }
0x137f   :  { %3012 = vmatpush3.bf16.xpose.msra.mxu1 %v1847_v33  ;;  %3013 = vmatprep.mubr.msk.bf16.mxu1 %vm3276_vm1, %v3275_v15 }
0x1380   :  { %3023 = vmatprep.subr.bf16.mxu1 %v3275_v15 }
0x1384   :  { %3008 = vmatmul.mubr.msk.bf16.vlgmr.msra.gmra.mrb[60].mxu0 %vm151_vm2, %v1790_v29 }
0x1385   :  { %3018 = vmatpush3.bf16.msra.mxu0 %v1911_v42  ;;  %3019 = vmatprep.mubr.msk.bf16.mxu0 %vm3276_vm1, %v3275_v15 }
0x1386   :  { %3014 = vmatmul.mubr.msk.bf16.vlgmr.msra.gmra.mrb[56].mxu1 %vm151_vm2, %v1840_v21  ;;  %3029 = vmatprep.subr.bf16.mxu0 %v3275_v15 }
0x1387   :  { %3024 = vmatpush3.bf16.msra.mxu1 %v1959_v40  ;;  %3025 = vmatprep.mubr.msk.bf16.mxu1 %vm3276_vm1, %v3275_v15 }
0x1388   :  { %3035 = vmatprep.subr.bf16.mxu1 %v3275_v15 }
0x144f   :  { %v3771_v44 = vpop.f32.mrb[56].mxu0 }
0x1450   :  { %v2997_v46 = vpop.f32.mrb[57].mxu0 }
0x1451   :  { %v1738_v47 = vpop.f32.mrb[58].mxu0  ;;  %v3773_v50 = vpop.f32.mrb[52].mxu1 }
0x1452   :  { %v3126_v51 = vpack.i.bf16 %v3773_v50, %v3771_v44  ;;  %v2998_v48 = vpop.f32.mrb[59].mxu0  ;;  %v3003_v45 = vpop.f32.mrb[53].mxu1 }
0x1453   :  { %v1786_v57 = vpop.f32.mrb[54].mxu1 }
0x1454   :  { %v3004_v31 = vpop.f32.mrb[55].mxu1 }
0x1457   :  { %v1833_v14 = vpop.f32.mrb[60].mxu0 }
0x1458   :  { %v1834_v32 = vadd.f32 %v3728_v36, %v1833_v14  ;;  %v3009_v37 = vpop.f32.mrb[61].mxu0 }
0x1459   :  { %v1836_v58 = vpop.f32.mrb[62].mxu0  ;;  %v1883_v16 = vpop.f32.mrb[56].mxu1 }
0x145a   :  { %v1889_v59 = vmul.f32 1.442695, %v1834_v32  ;;  %v1884_v61 = vadd.f32 %v3734_v60, %v1883_v16  ;;  %v3010_v0 = vpop.f32.mrb[63].mxu0  ;;  %v3015_v1 = vpop.f32.mrb[57].mxu1 }
0x145b   :  { %v1886_v2 = vpop.f32.mrb[58].mxu1 }
0x145c   :  { %3219 = vpow2.f32 %v1889_v59  ;;  %v1891_v4 = vmul.f32 1.442695, %v1884_v61  ;;  %v3016_v63 = vpop.f32.mrb[59].mxu1 }
0x145e   :  { %3221 = vpow2.f32 %v1891_v4 }
0x1466   :  { %v3220_v5 = vpop.eup %3219 }
0x1467   :  { %v1893_v26 = vsel %vm151_vm2, %v3220_v5, 0.0 }
0x1468   :  { %v3222_v6 = vpop.eup %3221  ;;  %1894 = vadd.xlane.f32.xlu1 %v1893_v26 }
0x1469   :  { %v1896_v7 = vsel %vm151_vm2, %v3222_v6, 0.0 }
0x146a   :  { %1897 = vadd.xlane.f32.xlu0 %v1896_v7 }
0x1479   :  { %2003 = vrot.lane.b32.xlu1 %v3657_v52, %s3285_s10 }
0x147d   :  { %2001 = vrot.lane.b32.xlu1 %v3657_v52, %s3286_s11 }
0x1480   :  { %2053 = vrot.lane.b32.xlu0 %v3659_v56, %s3285_s10 }
0x1484   :  { %2051 = vrot.lane.b32.xlu0 %v3659_v56, %s3286_s11 }
0x14f5   :  { %v1895_v53 = vpop.xlane.xlu1 %1894 }
0x14f6   :  { %3223 = vrcp.f32 %v1895_v53 }
0x14f7   :  { %v1898_v55 = vpop.xlane.xlu0 %1897 }
0x14f8   :  { %3225 = vrcp.f32 %v1898_v55 }
0x14f9   :  { %v2004_v13 = vpop.permute.xlu1 %2003 }
0x14fa   :  { %v2009_v21 = vsel %vm151_vm2, %v2004_v13, 0 }
0x14fb   :  { %v2054_v20 = vpop.permute.xlu0 %2053 }
0x14fc   :  { %v2059_v28 = vsel %vm151_vm2, %v2054_v20, 0 }
0x14fd   :  { %v2002_v29 = vpop.permute.xlu1 %2001 }
0x14ff   :  { %v2052_v33 = vpop.permute.xlu0 %2051 }
0x1500   :  { %v3224_v10 = vpop.eup %3223 }
0x1501   :  { %v1901_v8 = vmul.f32 %v3224_v10, %v3220_v5 }
0x1502   :  { %v3226_v12 = vpop.eup %3225 }
0x1503   :  { %v1902_v17 = vmul.f32 %v3226_v12, %v3222_v6  ;;  %v1903_v19 = vpack.c.bf16 %v1901_v8, %v1901_v8 }
0x1505   :  { %3020 = vmatmul.mubr.msk.bf16.vlgmr.msra.gmra.mrb[64].mxu0 %vm151_vm2, %v1903_v19  ;;  %v1904_v23 = vpack.c.bf16 %v1902_v17, %v1902_v17 }
0x1506   :  { %3030 = vmatpush3.bf16.xpose.msra.mxu0 %v2009_v21  ;;  %3031 = vmatprep.mubr.msk.bf16.mxu0 %vm3276_vm1, %v3275_v15 }
0x1507   :  { %3026 = vmatmul.mubr.msk.bf16.vlgmr.msra.gmra.mrb[60].mxu1 %vm151_vm2, %v1904_v23  ;;  %3041 = vmatprep.subr.bf16.mxu0 %v3275_v15 }
0x1508   :  { %3036 = vmatpush3.bf16.xpose.msra.mxu1 %v2059_v28  ;;  %3037 = vmatprep.mubr.msk.bf16.mxu1 %vm3276_vm1, %v3275_v15 }
0x1509   :  { %3047 = vmatprep.subr.bf16.mxu1 %v3275_v15 }
0x150d   :  { %3032 = vmatmul.mubr.msk.bf16.vlgmr.msra.gmra.mrb[68].mxu0 %vm151_vm2, %v2002_v29 }
0x150e   :  { %3043 = vmatprep.mubr.msk.bf16.mxu0 %vm3276_vm1, %v3275_v15 }
0x150f   :  { %3038 = vmatmul.mubr.msk.bf16.vlgmr.msra.gmra.mrb[64].mxu1 %vm151_vm2, %v2052_v33 }
0x1510   :  { %3049 = vmatprep.mubr.msk.bf16.mxu1 %vm3276_vm1, %v3275_v15 }
0x15d8   :  { %v1947_v34 = vpop.f32.mrb[64].mxu0 }
0x15d9   :  { %v3021_v35 = vpop.f32.mrb[65].mxu0 }
0x15da   :  { %v1950_v42 = vpop.f32.mrb[66].mxu0  ;;  %v1995_v40 = vpop.f32.mrb[60].mxu1 }
0x15db   :  { %v3131_v46 = vpack.i.bf16 %v1995_v40, %v1947_v34  ;;  %v3022_v47 = vpop.f32.mrb[67].mxu0  ;;  %v3027_v48 = vpop.f32.mrb[61].mxu1 }
0x15dc   :  { %v1998_v45 = vpop.f32.mrb[62].mxu1 }
0x15dd   :  { %v3028_v57 = vpop.f32.mrb[63].mxu1 }
0x15e0   :  { %v2045_v31 = vpop.f32.mrb[68].mxu0 }
0x15e1   :  { %v2046_v14 = vadd.f32 %v3728_v36, %v2045_v31  ;;  %v3033_v32 = vpop.f32.mrb[69].mxu0 }
0x15e2   :  { %v2048_v37 = vpop.f32.mrb[70].mxu0  ;;  %v2095_v58 = vpop.f32.mrb[64].mxu1 }
0x15e3   :  { %v2101_v16 = vmul.f32 1.442695, %v2046_v14  ;;  %v2096_v59 = vadd.f32 %v3734_v60, %v2095_v58  ;;  %v3034_v61 = vpop.f32.mrb[71].mxu0  ;;  %v3039_v0 = vpop.f32.mrb[65].mxu1 }
0x15e4   :  { %v2098_v1 = vpop.f32.mrb[66].mxu1 }
0x15e5   :  { %3227 = vpow2.f32 %v2101_v16  ;;  %v2103_v2 = vmul.f32 1.442695, %v2096_v59  ;;  %v3040_v4 = vpop.f32.mrb[67].mxu1 }
0x15e7   :  { %3229 = vpow2.f32 %v2103_v2 }
0x15ef   :  { %v3228_v63 = vpop.eup %3227 }
0x15f0   :  { %v2105_v5 = vsel %vm151_vm2, %v3228_v63, 0.0 }
0x15f1   :  { %v3230_v26 = vpop.eup %3229  ;;  %2106 = vadd.xlane.f32.xlu1 %v2105_v5 }
0x15f2   :  { %v2108_v36 = vsel %vm151_vm2, %v3230_v26, 0.0 }
0x15f3   :  { %2109 = vadd.xlane.f32.xlu0 %v2108_v36 }
0x1602   :  { %2165 = vrot.lane.b32.xlu1 %v3659_v56, %s3287_s12 }
0x1606   :  { %2248 = vrot.lane.b32.xlu1 %v3626_v9, %s3289_s14 }
0x1609   :  { %2117 = vrot.lane.b32.xlu0 %v3657_v52, %s3287_s12 }
0x160a   :  { %3132 = vrot.lane.b32.xlu1 %v3131_v46, %s3290_s15 }
0x160d   :  { %3127 = vrot.lane.b32.xlu0 %v3126_v51, %s3288_s13 }
0x160e   :  { %2250 = vrot.lane.b32.xlu1 %v3632_v11, %s3289_s14 }
0x167e   :  { %v2107_v60 = vpop.xlane.xlu1 %2106 }
0x167f   :  { %3231 = vrcp.f32 %v2107_v60 }
0x1680   :  { %v2110_v6 = vpop.xlane.xlu0 %2109 }
0x1681   :  { %3233 = vrcp.f32 %v2110_v6 }
0x1682   :  { %v2166_v56 = vpop.permute.xlu1 %2165 }
0x1683   :  { %v2171_v9 = vsel %vm267_vm3, %v2166_v56, 0 }
0x1684   :  { %v2118_v7 = vpop.permute.xlu0 %2117  ;;  %3048 = vmatpush3.bf16.msra.mxu1 %v2171_v9 }
0x1685   :  { %v2123_v52 = vsel %vm267_vm3, %v2118_v7, 0  ;;  %3061 = vmatprep.subr.bf16.mxu1 %v3275_v15 }
0x1686   :  { %3042 = vmatpush3.bf16.msra.mxu0 %v2123_v52  ;;  %v2249_v55 = vpop.permute.xlu1 %2248 }
0x1687   :  { %3053 = vmatprep.subr.bf16.mxu0 %v3275_v15 }
0x1688   :  { %v3128_v34 = vpop.permute.xlu0 %3127 }
0x1689   :  { %v3232_v44 = vpop.eup %3231  ;;  %v3130_v35 = vunpack.i.h.bf16 %v3128_v34  ;;  %v3129_v42 = vunpack.i.l.bf16 %v3128_v34 }
0x168a   :  { %v2113_v50 = vmul.f32 %v3232_v44, %v3228_v63  ;;  %v3133_v8 = vpop.permute.xlu1 %3132 }
0x168b   :  { %v3234_v51 = vpop.eup %3233  ;;  %v3135_v40 = vunpack.i.h.bf16 %v3133_v8  ;;  %v3134_v46 = vunpack.i.l.bf16 %v3133_v8  ;;  %v2238_v47 = vsel %vm151_vm2, %v3723_v54, %v3130_v35  ;;  %v2237_v48 = vsel %vm151_vm2, %v3721_v49, %v3129_v42 }
0x168c   :  { %v2114_v11 = vmul.f32 %v3234_v51, %v3230_v26  ;;  %v2115_v53 = vpack.c.bf16 %v2113_v50, %v2113_v50  ;;  %v2247_v49 = vrot.slane %v3640_v22, %v3580_v38  ;;  %v3152_v51 = vld [vmem:[%s3923_s2 + $0x34] ss:$8 sps:$4 sm:$0xff]  }
0x168d   :  { %v2240_v14 = vsel %vm1021_vm4, %v2238_v47, %v3135_v40  ;;  %v2239_v32 = vsel %vm1021_vm4, %v2237_v48, %v3134_v46 }
0x168e   :  { %3044 = vmatmul.mubr.msk.bf16.vlgmr.msra.gmra.mrb[72].mxu0 %vm151_vm2, %v2115_v53  ;;  %v2116_v10 = vpack.c.bf16 %v2114_v11, %v2114_v11  ;;  %v2251_v12 = vpop.permute.xlu1 %2250 }
0x168f   :  { %3054 = vmatpush3.bf16.msra.mxu0 %v2249_v55  ;;  %3057 = vmatprep.mubr.msk.bf16.mxu0 %vm3276_vm1, %v3275_v15 }
0x1690   :  { %3050 = vmatmul.mubr.msk.bf16.vlgmr.msra.gmra.mrb[68].mxu1 %vm151_vm2, %v2116_v10  ;;  %3055 = vmatprep.subr.bf16.mxu0 %v3275_v15 }
0x1691   :  { %3065 = vmatprep.mubr.msk.bf16.mxu1 %vm3276_vm1, %v3275_v15 }
0x1693   :  { %3056 = vmatpush3.bf16.msra.mxu0 %v2251_v12 }
0x1694   :  { %3069 = vmatprep.subr.bf16.mxu0 %v3275_v15 }
0x1761   :  { %v2159_v13 = vpop.f32.mrb[72].mxu0 }
0x1762   :  { %v3045_v17 = vpop.f32.mrb[73].mxu0 }
0x1763   :  { %v2162_v19 = vpop.f32.mrb[74].mxu0  ;;  %v2207_v20 = vpop.f32.mrb[68].mxu1  ;;  %v2329_v17 = vrot.slane %v3640_v22, %v1112_v62 }
0x1764   :  { %v3136_v21 = vpack.i.bf16 %v2207_v20, %v2159_v13  ;;  %v3046_v23 = vpop.f32.mrb[75].mxu0  ;;  %v3051_v28 = vpop.f32.mrb[69].mxu1 }
0x1765   :  { %v2210_v29 = vpop.f32.mrb[70].mxu1  ;;  %v2335_v28 = vrot.slane %v3640_v22, %v1118_v3  ;;  %v2342_v3 = vrot.slane %v3640_v22, %v1125_v18 }
0x1766   :  { %v3052_v33 = vpop.f32.mrb[71].mxu1  ;;  %3137 = vrot.lane.b32.xlu0 %v3136_v21, %s3291_s19 }
0x17d8   :  { %v3138_v45 = vpop.permute.xlu0 %3137 }
0x17d9   :  { %v3140_v57 = vunpack.i.h.bf16 %v3138_v45  ;;  %v3139_v31 = vunpack.i.l.bf16 %v3138_v45 }
0x17db   :  { %v2242_v37 = vsel %vm1024_vm5, %v2240_v14, %v3140_v57  ;;  %v2241_v58 = vsel %vm1024_vm5, %v2239_v32, %v3139_v31 }
0x17dc   :  { %v2243_v16 = vpack.c.bf16 %v2242_v37, %v2241_v58 }
0x17de   :  { %3058 = vmatmul.mubr.msk.bf16.vlgmr.msra.gmra.mrb[76].mxu0 %vm24_vm0, %v2243_v16 }
0x17df   :  { %3073 = vmatprep.mubr.msk.bf16.mxu0 %vm3276_vm1, %v3275_v15 }
0x18b1   :  { %v2291_v54 = vpop.f32.mrb[76].mxu0 }
0x18b2   :  { %v2292_v59 = vadd.f32 %v2291_v54, %v2247_v49  ;;  %v3059_v61 = vpop.f32.mrb[77].mxu0 }
0x18b3   :  { %v2294_v0 = vpop.f32.mrb[78].mxu0 }
0x18b4   :  { %v2295_v1 = vadd.f32 %v2294_v0, %v2247_v49  ;;  %v3060_v2 = vpop.f32.mrb[79].mxu0  ;;  %v2298_v4 = vadd.f32 %v2292_v59, %v3646_v41 }
0x18b6   :  { %v2300_v63 = vsel %vm24_vm0, %v2298_v4, 0.0  ;;  %v2299_v5 = vadd.f32 %v2295_v1, %v3648_v43  ;;  %v3151_v43 = vld [vmem:[%s3923_s2 + $0x24] ss:$8 sps:$4 sm:$0xff]  }
0x18b7   :  { %2301 = vadd.xlane.f32.xlu0 %v2300_v63  ;;  %3062 = vmatpush3.bf16.msra.mxu1 %v3151_v43 }
0x18b8   :  { %v2303_v26 = vsel %vm24_vm0, %v2299_v5, 0.0  ;;  %3063 = vmatprep.subr.bf16.mxu1 %v3275_v15 }
0x18b9   :  { %2304 = vadd.xlane.f32.xlu1 %v2303_v26 }
0x18bb   :  { %3064 = vmatpush3.bf16.msra.mxu1 %v3152_v51 }
0x18bc   :  { %3077 = vmatprep.subr.bf16.mxu1 %v3275_v15 }
0x18ca   :  { %2420 = vrot.lane.b32.xlu1 %v3152_v51, %s3278_s29 }
0x1944   :  { %v2302_v36 = vpop.xlane.xlu0 %2301 }
0x1945   :  { %v2306_v60 = vmul.f32 0.03125, %v2302_v36 }
0x1946   :  { %v2305_v6 = vpop.xlane.xlu1 %2304 }
0x1947   :  { %v2308_v56 = vsub.f32 %v2298_v4, %v2306_v60  ;;  %v2307_v9 = vmul.f32 0.03125, %v2305_v6 }
0x1949   :  { %v2309_v7 = vsub.f32 %v2299_v5, %v2307_v9  ;;  %v2310_v52 = vmul.f32 %v2308_v56, %v2308_v56 }
0x194a   :  { %v2421_v40 = vpop.permute.xlu1 %2420 }
0x194b   :  { %v2312_v44 = vsel %vm24_vm0, %v2310_v52, 0.0  ;;  %v2311_v50 = vmul.f32 %v2309_v7, %v2309_v7  ;;  %v2429_v46 = vsel %vm1206_vm6, %v2421_v40, 0 }
0x194c   :  { %2313 = vadd.xlane.f32.xlu0 %v2312_v44 }
0x194d   :  { %v2315_v41 = vsel %vm24_vm0, %v2311_v50, 0.0 }
0x1950   :  { %2316 = vadd.xlane.f32.xlu0 %v2315_v41 }
0x1966   :  { %2418 = vrot.lane.b32.xlu0 %v3151_v43, %s3278_s29 }
0x19d9   :  { %v2314_v11 = vpop.xlane.xlu0 %2313 }
0x19da   :  { %v2318_v53 = vmul.f32 0.03125, %v2314_v11 }
0x19dc   :  { %v2320_v55 = vadd.f32 1e-12, %v2318_v53 }
0x19dd   :  { %v2317_v10 = vpop.xlane.xlu0 %2316 }
0x19de   :  { %3235 = vrsqrt.f32 %v2320_v55  ;;  %v2319_v8 = vmul.f32 0.03125, %v2317_v10 }
0x19e0   :  { %v2321_v12 = vadd.f32 1e-12, %v2319_v8 }
0x19e1   :  { %v2419_v42 = vpop.permute.xlu0 %2418 }
0x19e2   :  { %3237 = vrsqrt.f32 %v2321_v12  ;;  %v2426_v62 = vsel %vm1206_vm6, %v2419_v42, 0  ;;  %v21_v42 = vld [vmem:[%s3924_s3 + $0x10] sm:$0xf]  ;;  %s3292_s3 = smov [#allocation2]  }
0x19e3   :  { %3070 = vmatpush3.bf16.xpose.msra.mxu0 %v2426_v62  ;;  %v2503_v62 = vrot.slane %v21_v42, %v3351_v25 }
0x19e4   :  { %3071 = vmatprep.subr.bf16.mxu0 %v3275_v15 }
0x19e8   :  { %v3236_v13 = vpop.eup %3235 }
0x19e9   :  { %v2324_v19 = vmul.f32 %v3236_v13, %v2308_v56  ;;  %v2417_v56 = vrot.slane %v3640_v22, %v1200_v27 }
0x19eb   :  { %v2330_v21 = vmul.f32 %v2329_v17, %v2324_v19  ;;  %3072 = vmatpush3.bf16.xpose.msra.mxu0 %v2429_v46  ;;  %v2509_v46 = vrot.slane %v21_v42, %v3361_v30 }
0x19ec   :  { %v3238_v20 = vpop.eup %3237 }
0x19ed   :  { %v2325_v23 = vmul.f32 %v3238_v20, %v2309_v7  ;;  %v2336_v33 = vadd.f32 %v2335_v28, %v2330_v21  ;;  %v3153_v20 = vld [vmem:[%s3923_s2 + $0x40] ss:$8 sps:$4 sm:$0xff]   ;;  %v3154_v21 = vld [vmem:[%s3923_s2 + $0x50] ss:$8 sps:$4 sm:$0xff]  }
0x19ef   :  { %v2331_v29 = vmul.f32 %v2329_v17, %v2325_v23 }
0x19f1   :  { %v2337_v34 = vadd.f32 %v2335_v28, %v2331_v29 }
0x19f3   :  { %v2338_v35 = vpack.c.bf16 %v2337_v34, %v2336_v33 }
0x19f5   :  { %3066 = vmatmul.mubr.msk.bf16.vlgmr.msra.gmra.mrb[72].mxu1 %vm24_vm0, %v2338_v35 }
0x19f6   :  { %3081 = vmatprep.mubr.msk.bf16.mxu1 %vm3276_vm1, %v3275_v15  ;;  %3078 = vmatpush3.bf16.msra.mxu1 %v3153_v20 }
0x19f7   :  { %3079 = vmatprep.subr.bf16.mxu1 %v3275_v15 }
0x19fa   :  { %3080 = vmatpush3.bf16.msra.mxu1 %v3154_v21 }
0x19fb   :  { %3085 = vmatprep.subr.bf16.mxu1 %v3275_v15 }
0x1ac8   :  { %v2388_v47 = vpop.f32.mrb[72].mxu1 }
0x1ac9   :  { %v2389_v48 = vadd.f32 %v2388_v47, %v2342_v3  ;;  %v3067_v45 = vpop.f32.mrb[73].mxu1 }
0x1aca   :  { %v2391_v57 = vpop.f32.mrb[74].mxu1 }
0x1acb   :  { %v2397_v31 = vmul.f32 0.044715, %v2389_v48  ;;  %v2392_v14 = vadd.f32 %v2391_v57, %v2342_v3  ;;  %v3068_v32 = vpop.f32.mrb[75].mxu1  ;;  %v2395_v63 = vmul.f32 0.5, %v2389_v48 }
0x1acd   :  { %v2399_v37 = vmul.f32 %v2397_v31, %v2389_v48  ;;  %v2398_v58 = vmul.f32 0.044715, %v2392_v14  ;;  %v2396_v5 = vmul.f32 0.5, %v2392_v14 }
0x1acf   :  { %v2401_v16 = vmul.f32 %v2399_v37, %v2389_v48  ;;  %v2400_v49 = vmul.f32 %v2398_v58, %v2392_v14 }
0x1ad1   :  { %v2403_v54 = vadd.f32 %v2401_v16, %v2389_v48  ;;  %v2402_v59 = vmul.f32 %v2400_v49, %v2392_v14 }
0x1ad3   :  { %v2405_v61 = vmul.f32 0.7978846, %v2403_v54  ;;  %v2404_v0 = vadd.f32 %v2402_v59, %v2392_v14 }
0x1ad5   :  { %3239 = vtanh.f32 %v2405_v61  ;;  %v2406_v1 = vmul.f32 0.7978846, %v2404_v0  ;;  %v2522_v61 = vrot.slane %v21_v42, %v3375_v39 }
0x1ad7   :  { %3241 = vtanh.f32 %v2406_v1 }
0x1adf   :  { %v3240_v2 = vpop.eup %3239 }
0x1ae0   :  { %v2409_v18 = vadd.f32 1.0, %v3240_v2 }
0x1ae1   :  { %v3242_v4 = vpop.eup %3241 }
0x1ae2   :  { %v2410_v26 = vadd.f32 1.0, %v3242_v4  ;;  %v2411_v36 = vmul.f32 %v2409_v18, %v2395_v63 }
0x1ae4   :  { %v2412_v60 = vmul.f32 %v2410_v26, %v2396_v5  ;;  %v2591_v26 = vrot.slane %v21_v42, %v3580_v38 }
0x1ae6   :  { %v2413_v6 = vpack.c.bf16 %v2412_v60, %v2411_v36 }
0x1ae8   :  { %3074 = vmatmul.mubr.msk.bf16.vlgmr.msra.gmra.mrb[80].mxu0 %vm1206_vm6, %v2413_v6 }
0x1bbb   :  { %v2465_v9 = vpop.f32.mrb[80].mxu0 }
0x1bbc   :  { %v2466_v7 = vadd.f32 %v2465_v9, %v2417_v56  ;;  %v3075_v52 = vpop.f32.mrb[81].mxu0 }
0x1bbd   :  { %v2468_v44 = vpop.f32.mrb[82].mxu0 }
0x1bbe   :  { %v2469_v50 = vadd.f32 %v2468_v44, %v2417_v56  ;;  %v3076_v41 = vpop.f32.mrb[83].mxu0  ;;  %v2472_v43 = vadd.f32 %v2466_v7, %v2336_v33 }
0x1bc0   :  { %v2474_v51 = vsel %vm24_vm0, %v2472_v43, 0.0  ;;  %v2473_v11 = vadd.f32 %v2469_v50, %v2337_v34 }
0x1bc1   :  { %2475 = vadd.xlane.f32.xlu0 %v2474_v51 }
0x1bc2   :  { %v2477_v53 = vsel %vm24_vm0, %v2473_v11, 0.0 }
0x1bc3   :  { %2478 = vadd.xlane.f32.xlu1 %v2477_v53 }
0x1c4e   :  { %v2476_v55 = vpop.xlane.xlu0 %2475 }
0x1c4f   :  { %v2480_v10 = vmul.f32 0.03125, %v2476_v55 }
0x1c50   :  { %v2479_v8 = vpop.xlane.xlu1 %2478 }
0x1c51   :  { %v2482_v24 = vsub.f32 %v2472_v43, %v2480_v10  ;;  %v2481_v12 = vmul.f32 0.03125, %v2479_v8 }
0x1c53   :  { %v2483_v27 = vsub.f32 %v2473_v11, %v2481_v12  ;;  %v2484_v22 = vmul.f32 %v2482_v24, %v2482_v24 }
0x1c55   :  { %v2486_v13 = vsel %vm24_vm0, %v2484_v22, 0.0  ;;  %v2485_v17 = vmul.f32 %v2483_v27, %v2483_v27 }
0x1c56   :  { %2487 = vadd.xlane.f32.xlu1 %v2486_v13 }
0x1c57   :  { %v2489_v19 = vsel %vm24_vm0, %v2485_v17, 0.0 }
0x1c58   :  { %2490 = vadd.xlane.f32.xlu0 %v2489_v19 }
0x1c67   :  { %2594 = vrot.lane.b32.xlu1 %v3154_v21, %s3277_s24 }
0x1c6e   :  { %2592 = vrot.lane.b32.xlu0 %v3153_v20, %s3277_s24  ;;  %s2649_s24 = sshll.u32 %s3292_s3, 4  ;;  %s2650_s24 = int_to_ptr.vmem [resolvable:$true] %s2649_s24 }
0x1c6f   :  { %s3251_s13 = scalar_lea.vmem %s2650_s24, 32  ;;  %p3256_p1 = scmp.lt.s32.totalorder %s2650_s24, %s2650_s24 }
0x1c70   :  { %p3252_p0 = scmp.ne.s32.totalorder %s2650_s24, %s3251_s13  ;;  %p3257_p2 = scmp.lt.s32.totalorder %s3251_s13, %s3251_s13 }
0x1c72   :  { %p3258_p3 = por %p3257_p2, %p3256_p1 }
0x1c74   :  { %p3259_p4 = pnand %p3258_p3, %p3252_p0 }
0x1ce3   :  { %v2488_v23 = vpop.xlane.xlu1 %2487 }
0x1ce4   :  { %v2492_v28 = vmul.f32 0.03125, %v2488_v23 }
0x1ce5   :  { %v2491_v29 = vpop.xlane.xlu0 %2490 }
0x1ce6   :  { %v2494_v33 = vadd.f32 1e-12, %v2492_v28  ;;  %v2493_v34 = vmul.f32 0.03125, %v2491_v29 }
0x1ce7   :  { %v2595_v30 = vpop.permute.xlu1 %2594 }
0x1ce8   :  { %3243 = vrsqrt.f32 %v2494_v33  ;;  %v2495_v35 = vadd.f32 1e-12, %v2493_v34 }
0x1ce9   :  { %v2593_v25 = vpop.permute.xlu0 %2592 }
0x1cea   :  { %3245 = vrsqrt.f32 %v2495_v35 }
0x1cf2   :  { %v3244_v40 = vpop.eup %3243 }
0x1cf3   :  { %v2498_v3 = vmul.f32 %v3244_v40, %v2482_v24 }
0x1cf4   :  { %v3246_v47 = vpop.eup %3245 }
0x1cf5   :  { %v2504_v48 = vmul.f32 %v2503_v62, %v2498_v3  ;;  %v2499_v45 = vmul.f32 %v3246_v47, %v2483_v27 }
0x1cf7   :  { %v2510_v57 = vadd.f32 %v2509_v46, %v2504_v48  ;;  %v2505_v31 = vmul.f32 %v2503_v62, %v2499_v45 }
0x1cf9   :  { %v2511_v14 = vadd.f32 %v2509_v46, %v2505_v31  ;;  %v2517_v32 = vpack.c.bf16 %v2510_v57, %v2510_v57 }
0x1cfb   :  { %v2518_v37 = vpack.c.bf16 %v2511_v14, %v2511_v14  ;;  %v2525_v16 = vunpack.c.l.b16 %v2517_v32 }
0x1cfd   :  { %v2526_v58 = vunpack.c.l.b16 %v2518_v37 }
0x1cff   :  { %v2527_v49 = vrot.slane %v2526_v58, 7 }
0x1d01   :  { %v2529_v54 = vsel %vm2528_vm7, %v2527_v49, %v2525_v16 }
0x1d02   :  { %v2530_v59 = vpack.c.b16 %v2529_v54, %v2529_v54 }
0x1d04   :  { %3082 = vmatmul.mubr.msk.bf16.vlgmr.msra.gmra.mrb[76].mxu1 %vm24_vm0, %v2530_v59 }
0x1d05   :  { %3089 = vmatprep.mubr.msk.bf16.mxu1 %vm3276_vm1, %v3275_v15  ;;  %3086 = vmatpush3.bf16.msra.mxu1 %v2593_v25 }
0x1d06   :  { %3087 = vmatprep.subr.bf16.mxu1 %v3275_v15 }
0x1d09   :  { %3088 = vmatpush3.bf16.msra.mxu1 %v2595_v30 }
0x1dd7   :  { %v2580_v0 = vpop.f32.mrb[76].mxu1 }
0x1dd8   :  { %v2581_v1 = vadd.f32 %v2580_v0, %v2522_v61  ;;  %v3083_v2 = vpop.f32.mrb[77].mxu1 }
0x1dd9   :  { %v2583_v18 = vpop.f32.mrb[78].mxu1 }
0x1dda   :  { %3247 = vtanh.f32 %v2581_v1  ;;  %v3084_v4 = vpop.f32.mrb[79].mxu1 }
0x1de4   :  { %v3248_v63 = vpop.eup %3247 }
0x1de5   :  { %v2587_v5 = vpack.c.bf16 %v3248_v63, %v3248_v63 }
0x1de7   :  { %3090 = vmatmul.mubr.msk.bf16.vlgmr.msra.gmra.mrb[80].mxu1 %vm24_vm0, %v2587_v5 }
0x1eba   :  { %v2635_v36 = vpop.f32.mrb[80].mxu1 }
0x1ebb   :  { %v2636_v15 = vadd.f32 %v2635_v36, %v2591_v26  ;;  %v3091_v60 = vpop.f32.mrb[81].mxu1 }
0x1ebc   :  { %v2638_v39 = vpop.f32.mrb[82].mxu1 }
0x1ebd   :  { %v3092_v6 = vpop.f32.mrb[83].mxu1  ;;  %2642 = vst.msk [vmem:[#allocation2] sm:$0x3] %vm2641_vm8, %v2636_v15 }
0x1ebe   :  { %3262 = shalt.err (!%p3259_p4)
}
0x1ebf   :  { %s3263_s16 = scalar_lea.hbm %s3925_s4, 32 }
0x1ec0   :  { %p3264_p5 = scmp.ne.s32.totalorder %s3925_s4, %s3263_s16  ;;  %p3267_p6 = scmp.lt.u32.totalorder %s3263_s16, %s3925_s4 }
0x1ec2   :  { %p3269_p7 = pnand %p3267_p6, %p3264_p5 }
0x1ec4   :  { %3272 = shalt.err (!%p3269_p7)
}
0x1ec5   :  { %2652 = dma.vmem_to_hbm [thread:$0]  %s2650_s24, 32, %s3925_s4, [#allocation3]  }
0x1ec6   :  { %3273 = dma.done.wait [#allocation3], 32  }
0x1ec7   :  { %3274 = vsyncadd [#allocation3], 4294967264 }
0x1ec8   :  { %2656 = vsyncpa [#allocation3], 1 }

</bundles_post_ra>
